<compile_context>
chip_gen: v6e
topology: v6e:2x2x1
jax: 0.10.0
libtpu: 0.0.40
codegen_flags: <defaults>
</compile_context>

<pallas_src>
import math
from functools import partial

import numpy as np
import jax
import jax.numpy as jnp
from jax.experimental import pallas as pl
from jax.experimental.pallas import tpu as pltpu

# --------------------------------------------------------------------------
# Model hyper-parameters (small, consistent with the module's forward)
# --------------------------------------------------------------------------
HIDDEN_DIM = 32
OUT_DIM = 16
NUM_LAYERS = 2
NUM_GRAPHS = 2          # B
NODES_PER_GRAPH = 8     # N (equal-sized graphs -> to_dense_batch has no padding)

ATOM_FEATURE_DIMS = [119, 5, 12, 12, 10, 6, 6, 2, 2]   # OGB AtomEncoder vocab sizes
BOND_FEATURE_DIMS = [5, 6, 2]                           # OGB BondEncoder vocab sizes

_BIG_NEG = -1e9
_LN_EPS = 1e-5


# --------------------------------------------------------------------------
# Fused Pallas kernel: all layers + both streams + graph-pred head
# --------------------------------------------------------------------------
def _fused_forward_kernel(nf_ref, ef_ref, gf_ref, mb_ref,
                          W126_ref, bc_ref, bo1_ref, We_ref, Wg_ref,
                          Wm1_ref, bm1_ref, Wm2_ref, bm2_ref,
                          O2_ref, bo2_ref,
                          lng_ref, lnb_ref, Wr_ref, br_ref,
                          Wp1_ref, bp1_ref, Wp2_ref, bp2_ref,
                          out_ref, z_ref):
    node_fts = nf_ref[...]            # (B*N, H)    bf16
    e_flat = ef_ref[...]              # (B*N*N, He) bf16
    g = gf_ref[...]                   # (B, He)     bf16
    mbias = mb_ref[...]               # (B, N, N)   f32 additive mask: 0 or -1e9

    BN, H = node_fts.shape
    B, N, _ = mbias.shape
    H2 = 2 * H
    num_layers = W126_ref.shape[0]
    f32 = jnp.float32
    bf16 = jnp.bfloat16

    # Persistent lane-dense z slab: [node_fts | hidden]; no per-layer concatenate.
    z_ref[:, :H] = node_fts
    z_ref[:, H:] = jnp.zeros((BN, H), bf16)

    # Hoisted: additive adjacency bias shared by all layers / both streams.
    mbias4 = mbias.reshape(B, N, N, 1)

    hidden = jnp.zeros((BN, H), f32)

    for l in range(num_layers):       # static unrolled layer loop, state stays in VMEM
        z = z_ref[...]                                                       # (B*N, 2H) bf16

        # Fused msg_1 / msg_2 / o1 for both streams: one lane-dense (2H, 6H) matmul.
        m = jnp.dot(z, W126_ref[l], preferred_element_type=f32)              # (B*N, 6H)
        m1 = m[:, :H2]                # [stream0 | stream1] msg_1(z[j])
        m2 = m[:, H2:2 * H2]          # [stream0 | stream1] msg_2(z[i])
        h1 = m[:, 2 * H2:] + bo1_ref[l]                                      # o1(z) + bias

        # Edge messages for both streams in one matmul.
        me = jnp.dot(e_flat, We_ref[l], preferred_element_type=f32)          # (B*N*N, 2H)

        # graph message (g @ Wg) + precombined biases (b1+b2+be+bg), folded into the
        # per-receiver rows of m2 instead of the (B,N,N,2H) tensor.
        bias_all = (jnp.dot(g, Wg_ref[l], preferred_element_type=f32)
                    + bc_ref[l])                                             # (B, 2H)
        m2b = m2.reshape(B, N, H2) + bias_all.reshape(B, 1, H2)              # (B, N, 2H)

        # msgs[b,i,j,:] = m1[b,j] + m2[b,i] + me[b,i,j] + bias_all[b]
        msgs = (m1.reshape(B, 1, N, H2)
                + m2b.reshape(B, N, 1, H2)
                + me.reshape(B, N, N, H2))
        msgs = jax.nn.relu(msgs)

        # msgs MLP (block-diagonal over streams), kept in flat 2-D layout; bf16 matmuls.
        mm = msgs.reshape(B * N * N, H2)
        mm = jax.nn.relu(jnp.dot(mm.astype(bf16), Wm1_ref[l],
                                 preferred_element_type=f32) + bm1_ref[l])
        mm = jnp.dot(mm.astype(bf16), Wm2_ref[l],
                     preferred_element_type=f32) + bm2_ref[l]
        msgs = mm.reshape(B, N, N, H2)

        # Additive-masked max over senders (axis i), both streams at once.
        red = jnp.max(msgs + mbias4, axis=1).reshape(BN, H2)                 # (B*N, 2H)

        # Node update: o1 already computed from the fused matmul; block-diagonal o2.
        h2 = jnp.dot(red.astype(bf16), O2_ref[l],
                     preferred_element_type=f32) + bo2_ref[l]
        ret = jax.nn.relu(h1 + h2)                                           # (B*N, 2H)

        # Per-stream LayerNorm over each H-wide half of the fused feature axis (f32).
        r0 = ret[:, :H]
        r1 = ret[:, H:]
        mu0 = jnp.mean(r0, axis=-1, keepdims=True)
        mu1 = jnp.mean(r1, axis=-1, keepdims=True)
        v0 = jnp.mean((r0 - mu0) ** 2, axis=-1, keepdims=True)
        v1 = jnp.mean((r1 - mu1) ** 2, axis=-1, keepdims=True)
        n0 = (r0 - mu0) * jax.lax.rsqrt(v0 + _LN_EPS)
        n1 = (r1 - mu1) * jax.lax.rsqrt(v1 + _LN_EPS)
        cat = jnp.concatenate([n0, n1], axis=-1) * lng_ref[l] + lnb_ref[l]   # (B*N, 2H)

        # 2H -> H reduction linear (torch.cat([random_out, pretrained_out]) @ Wr) + ReLU.
        hidden = jax.nn.relu(jnp.dot(cat.astype(bf16), Wr_ref[l],
                                     preferred_element_type=f32) + br_ref[l])  # (B*N, H)
        z_ref[:, H:] = hidden.astype(bf16)

    # Graph-prediction head: mean pool over nodes + Linear/ReLU/Linear.
    # TODO(synk): if out_dim/B grow, pad Wp2/out to a multiple of 128 lanes for
    # unmasked stores; negligible at (2, 16).
    emb = jnp.mean(hidden.reshape(B, N, H), axis=1)                          # (B, H)
    t = jax.nn.relu(jnp.dot(emb.astype(bf16), Wp1_ref[...],
                            preferred_element_type=f32) + bp1_ref[...])
    out_ref[...] = (jnp.dot(t.astype(bf16), Wp2_ref[...],
                            preferred_element_type=f32) + bp2_ref[...])


# --------------------------------------------------------------------------
# pallas_call wrapper
# --------------------------------------------------------------------------
def _full_spec(a):
    nd = a.ndim
    return pl.BlockSpec(a.shape, lambda *_: (0,) * nd)


def parallel_mpnn_pallas(node_fts_flat, edge_fts_flat, graph_fts, mask_bias, fused):
    B = mask_bias.shape[0]
    BN, H = node_fts_flat.shape
    BNN = edge_fts_flat.shape[0]
    H2 = 2 * H
    out_dim = fused["Wp2"].shape[-1]
    L = fused["W126"].shape[0]

    args = (node_fts_flat, edge_fts_flat, graph_fts, mask_bias,
            fused["W126"], fused["bc"], fused["bo1"], fused["We"], fused["Wg"],
            fused["Wm1"], fused["bm1"], fused["Wm2"], fused["bm2"],
            fused["O2"], fused["bo2"],
            fused["lng"], fused["lnb"], fused["Wr"], fused["br"],
            fused["Wp1"], fused["bp1"], fused["Wp2"], fused["bp2"])

    # Advisory cost estimate so XLA can overlap the embedding gathers / edge scatter.
    flops_per_layer = (2 * BN * H2 * (3 * H2)        # fused z matmul (msg1|msg2|o1)
                       + 2 * BNN * H * H2            # edge messages
                       + 2 * B * H * H2              # graph messages
                       + 2 * 2 * BNN * H2 * H2       # msgs MLP (2 layers)
                       + 2 * BN * H2 * H2            # o2
                       + 2 * BN * H2 * H)            # reduction linear
    flops = L * flops_per_layer + 2 * B * H * H + 2 * B * H * out_dim
    bytes_accessed = sum(int(a.size) * a.dtype.itemsize for a in args) + B * out_dim * 4

    return pl.pallas_call(
        _fused_forward_kernel,
        out_shape=jax.ShapeDtypeStruct((B, out_dim), jnp.float32),
        grid=(1,),
        in_specs=[_full_spec(a) for a in args],
        out_specs=pl.BlockSpec((B, out_dim), lambda *_: (0, 0)),
        scratch_shapes=[pltpu.VMEM((BN, 2 * H), jnp.bfloat16)],   # persistent z slab
        compiler_params=pltpu.CompilerParams(dimension_semantics=("arbitrary",)),
        cost_estimate=pl.CostEstimate(flops=int(flops),
                                      transcendentals=int(2 * L * BN),
                                      bytes_accessed=int(bytes_accessed)),
    )(*args)


# --------------------------------------------------------------------------
# Parameter init (PyTorch-Linear-style uniform) + stream/layer fusion
# --------------------------------------------------------------------------
def _linear(key, fan_in, fan_out):
    k1, k2 = jax.random.split(key)
    bound = 1.0 / math.sqrt(fan_in)
    W = jax.random.uniform(k1, (fan_in, fan_out), jnp.float32, -bound, bound)
    b = jax.random.uniform(k2, (1, fan_out), jnp.float32, -bound, bound)
    return W, b


def _mpnn_stream_params(key, H):
    keys = jax.random.split(key, 8)
    p = {}
    p["W1"], p["b1"] = _linear(keys[0], 2 * H, H)     # m_1(z)
    p["W2"], p["b2"] = _linear(keys[1], 2 * H, H)     # m_2(z)
    p["We"], p["be"] = _linear(keys[2], H, H)         # m_e(edge_fts)
    p["Wg"], p["bg"] = _linear(keys[3], H, H)         # m_g(graph_fts)
    p["Wm1"], p["bm1"] = _linear(keys[4], H, H)       # msgs MLP layer 1
    p["Wm2"], p["bm2"] = _linear(keys[5], H, H)       # msgs MLP layer 2
    p["O1"], p["bo1"] = _linear(keys[6], 2 * H, H)    # o1(z)
    p["O2"], p["bo2"] = _linear(keys[7], H, H)        # o2(msgs)
    p["lng"] = jnp.ones((1, H), jnp.float32)
    p["lnb"] = jnp.zeros((1, H), jnp.float32)
    return p


def _block_diag2(A, B_):
    top = jnp.concatenate([A, jnp.zeros((A.shape[0], B_.shape[1]), A.dtype)], axis=1)
    bot = jnp.concatenate([jnp.zeros((B_.shape[0], A.shape[1]), A.dtype), B_], axis=1)
    return jnp.concatenate([top, bot], axis=0)


# Matmul weights cast to bf16 (native MXU mode on v5e/v6e/v7x); biases/LN stay f32.
_BF16_WEIGHTS = ("W126", "We", "Wg", "Wm1", "Wm2", "O2", "Wr", "Wp1", "Wp2")


def init_fused_params(key, hidden_dim, out_dim, num_layers):
    """Initializes per-stream MPNN weights and fuses them (stream 0 = 'random',
    stream 1 = 'pretrained'; both randomly initialized here) into wide matmuls."""
    H = hidden_dim
    names = ("W126", "bc", "bo1", "We", "Wg", "Wm1", "bm1", "Wm2", "bm2",
             "O2", "bo2", "lng", "lnb", "Wr", "br")
    per_layer = {n: [] for n in names}
    for _ in range(num_layers):
        key, k_rand, k_pre, k_red = jax.random.split(key, 4)
        p0 = _mpnn_stream_params(k_rand, H)   # random MPNN
        p1 = _mpnn_stream_params(k_pre, H)    # "pretrained" MPNN (random init, no checkpoint)

        def cat(name):
            return jnp.concatenate([p0[name], p1[name]], axis=-1)

        # Fused z-side weight: [msg_1 | msg_2 | o1] for both streams -> (2H, 6H).
        per_layer["W126"].append(
            jnp.concatenate([cat("W1"), cat("W2"), cat("O1")], axis=1))
        per_layer["bc"].append(cat("b1") + cat("b2") + cat("be") + cat("bg"))   # (1, 2H)
        per_layer["bo1"].append(cat("bo1"))                                     # (1, 2H)
        per_layer["We"].append(cat("We"))                                       # (He, 2H)
        per_layer["Wg"].append(cat("Wg"))                                       # (He, 2H)
        per_layer["Wm1"].append(_block_diag2(p0["Wm1"], p1["Wm1"]))             # (2H, 2H)
        per_layer["bm1"].append(cat("bm1"))
        per_layer["Wm2"].append(_block_diag2(p0["Wm2"], p1["Wm2"]))
        per_layer["bm2"].append(cat("bm2"))
        per_layer["O2"].append(_block_diag2(p0["O2"], p1["O2"]))
        per_layer["bo2"].append(cat("bo2"))
        per_layer["lng"].append(cat("lng"))
        per_layer["lnb"].append(cat("lnb"))
        Wr, br = _linear(k_red, 2 * H, H)                                       # reduction_layers[i]
        per_layer["Wr"].append(Wr)
        per_layer["br"].append(br)

    fused = {n: jnp.stack(v, axis=0) for n, v in per_layer.items()}             # leading layer dim
    key, k1, k2 = jax.random.split(key, 3)
    fused["Wp1"], fused["bp1"] = _linear(k1, H, H)          # graph_pred layer 1
    fused["Wp2"], fused["bp2"] = _linear(k2, H, out_dim)    # graph_pred layer 2

    for n in _BF16_WEIGHTS:
        fused[n] = fused[n].astype(jnp.bfloat16)

    # AtomEncoder / BondEncoder: per-feature embedding tables (summed lookups).
    atom_embs, bond_embs = [], []
    for dim in ATOM_FEATURE_DIMS:
        key, k = jax.random.split(key)
        atom_embs.append(0.1 * jax.random.normal(k, (dim, H), jnp.float32))
    for dim in BOND_FEATURE_DIMS:
        key, k = jax.random.split(key)
        bond_embs.append(0.1 * jax.random.normal(k, (dim, H), jnp.float32))
    return fused, atom_embs, bond_embs


# --------------------------------------------------------------------------
# Full forward pass (jit-able end to end; hot path in one Pallas kernel)
# --------------------------------------------------------------------------
@partial(jax.jit, static_argnames=("num_graphs", "max_nodes"))
def parallel_mpnn_forward(fused, atom_embs, bond_embs, x, edge_index, edge_attr, batch_idx,
                          num_graphs, max_nodes):
    H = HIDDEN_DIM
    # Atom / Bond encoders: sum of per-feature embedding lookups (device-side gathers).
    node_fts = sum(atom_embs[k][x[:, k]] for k in range(len(atom_embs)))            # (num_nodes, H)
    edge_fts = sum(bond_embs[k][edge_attr[:, k]] for k in range(len(bond_embs)))    # (E, H)

    B, N = num_graphs, max_nodes
    # to_dense_batch: contiguous equal-sized graphs -> node rows are already the dense
    # (B*N, H) layout the kernel consumes. bf16 operands for the MXU.
    node_fts_flat = node_fts.astype(jnp.bfloat16)

    # Dense edge-feature construction as ONE device-side scatter. Per-graph node offset
    # is the min node id over that graph's edges (matches local_edge_index.min()).
    # TODO(synk): duplicate (graph,src,dst) edges resolve as last-write-wins (same as
    # the reference's indexing assignment, but nondeterministic between duplicates).
    gid = batch_idx[edge_index[0]]
    edge_min = jnp.minimum(edge_index[0], edge_index[1])
    graph_off = (jnp.full((B,), jnp.iinfo(jnp.int32).max, jnp.int32)
                 .at[gid].min(edge_min))
    local_src = edge_index[0] - graph_off[gid]
    local_dst = edge_index[1] - graph_off[gid]
    edge_dense = (jnp.zeros((B, N, N, H), jnp.bfloat16)
                  .at[gid, local_src, local_dst].set(edge_fts.astype(jnp.bfloat16)))
    edge_flat = edge_dense.reshape(B * N * N, H)

    graph_fts = jnp.zeros((B, H), jnp.bfloat16)

    # Additive adjacency mask (0 where connected, -1e9 elsewhere). Reference forward
    # uses an all-ones adjacency, so this is all zeros; kept for generality.
    adj_mat = jnp.ones((B, N, N), jnp.float32)
    mask_bias = jnp.where(adj_mat > 0.0, 0.0, _BIG_NEG).astype(jnp.float32)

    return parallel_mpnn_pallas(node_fts_flat, edge_flat, graph_fts, mask_bias, fused)  # (B, out_dim)


# --------------------------------------------------------------------------
# Main
# --------------------------------------------------------------------------
if __name__ == "__main__":
    key = jax.random.PRNGKey(0)
    key, k_params, k_x, k_e = jax.random.split(key, 4)

    fused, atom_embs, bond_embs = init_fused_params(k_params, HIDDEN_DIM, OUT_DIM, NUM_LAYERS)

    num_nodes = NUM_GRAPHS * NODES_PER_GRAPH

    # Node features: categorical atom features (num_nodes, 9).
    x_cols = []
    for dim in ATOM_FEATURE_DIMS:
        k_x, kk = jax.random.split(k_x)
        x_cols.append(jax.random.randint(kk, (num_nodes,), 0, dim))
    x = jnp.stack(x_cols, axis=1)

    # Edges: bidirectional ring within each graph (global node ids).
    src, dst = [], []
    for g in range(NUM_GRAPHS):
        off = g * NODES_PER_GRAPH
        for i in range(NODES_PER_GRAPH):
            j = (i + 1) % NODES_PER_GRAPH
            src += [off + i, off + j]
            dst += [off + j, off + i]
    edge_index = jnp.asarray(np.stack([np.array(src), np.array(dst)], axis=0), jnp.int32)
    num_edges = edge_index.shape[1]

    # Edge attributes: categorical bond features (E, 3).
    e_cols = []
    for dim in BOND_FEATURE_DIMS:
        k_e, kk = jax.random.split(k_e)
        e_cols.append(jax.random.randint(kk, (num_edges,), 0, dim))
    edge_attr = jnp.stack(e_cols, axis=1)

    batch_idx = jnp.asarray(np.repeat(np.arange(NUM_GRAPHS), NODES_PER_GRAPH), jnp.int32)

    out = parallel_mpnn_forward(fused, atom_embs, bond_embs, x, edge_index, edge_attr, batch_idx,
                                num_graphs=NUM_GRAPHS, max_nodes=NODES_PER_GRAPH)
    out = jax.block_until_ready(out)

    assert out.shape == (NUM_GRAPHS, OUT_DIM)
    assert bool(jnp.all(jnp.isfinite(out)))
    print("KERNEL_OK")
</pallas_src>

<mosaic_0001>
module attributes {stable_mosaic.version = 11 : i64} {
  func.func private @main(%arg0: i32) attributes {dimension_semantics = [#tpu.dimension_semantics<core_parallel>], iteration_bounds = array<i64: 2>, tpu.core_type = #tpu.core_type<sc_scalar_subcore>, window_params = []} {
    return
  }
}

module attributes {stable_mosaic.version = 11 : i64} {
  func.func private @main(%arg0: i32) attributes {dimension_semantics = [#tpu.dimension_semantics<core_parallel>], iteration_bounds = array<i64: 2>, tpu.core_type = #tpu.core_type<sc_scalar_subcore>, window_params = []} {
    return
  }
}

module attributes {stable_mosaic.version = 11 : i64} {
  func.func @_fused_forward_kernel(%arg0: i32, %arg1: memref<16x32xbf16, #tpu.memory_space<vmem>>, %arg2: memref<128x32xbf16, #tpu.memory_space<vmem>>, %arg3: memref<2x32xbf16, #tpu.memory_space<vmem>>, %arg4: memref<2x8x8xf32, #tpu.memory_space<vmem>>, %arg5: memref<2x64x192xbf16, #tpu.memory_space<vmem>>, %arg6: memref<2x1x64xf32, #tpu.memory_space<vmem>>, %arg7: memref<2x1x64xf32, #tpu.memory_space<vmem>>, %arg8: memref<2x32x64xbf16, #tpu.memory_space<vmem>>, %arg9: memref<2x32x64xbf16, #tpu.memory_space<vmem>>, %arg10: memref<2x64x64xbf16, #tpu.memory_space<vmem>>, %arg11: memref<2x1x64xf32, #tpu.memory_space<vmem>>, %arg12: memref<2x64x64xbf16, #tpu.memory_space<vmem>>, %arg13: memref<2x1x64xf32, #tpu.memory_space<vmem>>, %arg14: memref<2x64x64xbf16, #tpu.memory_space<vmem>>, %arg15: memref<2x1x64xf32, #tpu.memory_space<vmem>>, %arg16: memref<2x1x64xf32, #tpu.memory_space<vmem>>, %arg17: memref<2x1x64xf32, #tpu.memory_space<vmem>>, %arg18: memref<2x64x32xbf16, #tpu.memory_space<vmem>>, %arg19: memref<2x1x32xf32, #tpu.memory_space<vmem>>, %arg20: memref<32x32xbf16, #tpu.memory_space<vmem>>, %arg21: memref<1x32xf32, #tpu.memory_space<vmem>>, %arg22: memref<32x16xbf16, #tpu.memory_space<vmem>>, %arg23: memref<1x16xf32, #tpu.memory_space<vmem>>, %arg24: memref<2x16xf32, #tpu.memory_space<vmem>>, %arg25: memref<16x64xbf16, #tpu.memory_space<vmem>>) attributes {dimension_semantics = [#tpu.dimension_semantics<arbitrary>], iteration_bounds = array<i64: 1>, scalar_prefetch = 0 : i64, scratch_operands = 1 : i64, tpu.core_type = #tpu.core_type<tc>, window_params = [{pipeline_mode = #tpu.pipeline_mode<synchronous>, transform_indices = @transform_0, window_bounds = array<i64: 16, 32>}, {pipeline_mode = #tpu.pipeline_mode<synchronous>, transform_indices = @transform_1, window_bounds = array<i64: 128, 32>}, {pipeline_mode = #tpu.pipeline_mode<synchronous>, transform_indices = @transform_2, window_bounds = array<i64: 2, 32>}, {pipeline_mode = #tpu.pipeline_mode<synchronous>, transform_indices = @transform_3, window_bounds = array<i64: 2, 8, 8>}, {pipeline_mode = #tpu.pipeline_mode<synchronous>, transform_indices = @transform_4, window_bounds = array<i64: 2, 64, 192>}, {pipeline_mode = #tpu.pipeline_mode<synchronous>, transform_indices = @transform_5, window_bounds = array<i64: 2, 1, 64>}, {pipeline_mode = #tpu.pipeline_mode<synchronous>, transform_indices = @transform_6, window_bounds = array<i64: 2, 1, 64>}, {pipeline_mode = #tpu.pipeline_mode<synchronous>, transform_indices = @transform_7, window_bounds = array<i64: 2, 32, 64>}, {pipeline_mode = #tpu.pipeline_mode<synchronous>, transform_indices = @transform_8, window_bounds = array<i64: 2, 32, 64>}, {pipeline_mode = #tpu.pipeline_mode<synchronous>, transform_indices = @transform_9, window_bounds = array<i64: 2, 64, 64>}, {pipeline_mode = #tpu.pipeline_mode<synchronous>, transform_indices = @transform_10, window_bounds = array<i64: 2, 1, 64>}, {pipeline_mode = #tpu.pipeline_mode<synchronous>, transform_indices = @transform_11, window_bounds = array<i64: 2, 64, 64>}, {pipeline_mode = #tpu.pipeline_mode<synchronous>, transform_indices = @transform_12, window_bounds = array<i64: 2, 1, 64>}, {pipeline_mode = #tpu.pipeline_mode<synchronous>, transform_indices = @transform_13, window_bounds = array<i64: 2, 64, 64>}, {pipeline_mode = #tpu.pipeline_mode<synchronous>, transform_indices = @transform_14, window_bounds = array<i64: 2, 1, 64>}, {pipeline_mode = #tpu.pipeline_mode<synchronous>, transform_indices = @transform_15, window_bounds = array<i64: 2, 1, 64>}, {pipeline_mode = #tpu.pipeline_mode<synchronous>, transform_indices = @transform_16, window_bounds = array<i64: 2, 1, 64>}, {pipeline_mode = #tpu.pipeline_mode<synchronous>, transform_indices = @transform_17, window_bounds = array<i64: 2, 64, 32>}, {pipeline_mode = #tpu.pipeline_mode<synchronous>, transform_indices = @transform_18, window_bounds = array<i64: 2, 1, 32>}, {pipeline_mode = #tpu.pipeline_mode<synchronous>, transform_indices = @transform_19, window_bounds = array<i64: 32, 32>}, {pipeline_mode = #tpu.pipeline_mode<synchronous>, transform_indices = @transform_20, window_bounds = array<i64: 1, 32>}, {pipeline_mode = #tpu.pipeline_mode<synchronous>, transform_indices = @transform_21, window_bounds = array<i64: 32, 16>}, {pipeline_mode = #tpu.pipeline_mode<synchronous>, transform_indices = @transform_22, window_bounds = array<i64: 1, 16>}, {pipeline_mode = #tpu.pipeline_mode<synchronous>, transform_indices = @transform_23, window_bounds = array<i64: 2, 16>}]} {
    %c0 = arith.constant 0 : index
    %c0_0 = arith.constant 0 : index
    %0 = vector.load %arg1[%c0, %c0_0] : memref<16x32xbf16, #tpu.memory_space<vmem>>, vector<16x32xbf16>
    %c0_1 = arith.constant 0 : index
    %c0_2 = arith.constant 0 : index
    %1 = vector.load %arg2[%c0_1, %c0_2] : memref<128x32xbf16, #tpu.memory_space<vmem>>, vector<128x32xbf16>
    %c0_3 = arith.constant 0 : index
    %c0_4 = arith.constant 0 : index
    %2 = vector.load %arg3[%c0_3, %c0_4] : memref<2x32xbf16, #tpu.memory_space<vmem>>, vector<2x32xbf16>
    %c0_5 = arith.constant 0 : index
    %c0_6 = arith.constant 0 : index
    %c0_7 = arith.constant 0 : index
    %3 = vector.load %arg4[%c0_5, %c0_6, %c0_7] : memref<2x8x8xf32, #tpu.memory_space<vmem>>, vector<2x8x8xf32>
    %c0_8 = arith.constant 0 : index
    %c0_9 = arith.constant 0 : index
    %4 = vector.load %arg25[%c0_8, %c0_9] : memref<16x64xbf16, #tpu.memory_space<vmem>>, vector<16x32xbf16>
    tpu.vector_store %arg25[%c0_8, %c0_9], %0 {strides = array<i32>} : memref<16x64xbf16, #tpu.memory_space<vmem>>, vector<16x32xbf16>,
    %cst = arith.constant 0.000000e+00 : bf16
    %5 = vector.broadcast %cst : bf16 to vector<16x32xbf16>
    %c0_10 = arith.constant 0 : index
    %c32 = arith.constant 32 : index
    %6 = vector.load %arg25[%c0_10, %c32] : memref<16x64xbf16, #tpu.memory_space<vmem>>, vector<16x32xbf16>
    tpu.vector_store %arg25[%c0_10, %c32], %5 {strides = array<i32>} : memref<16x64xbf16, #tpu.memory_space<vmem>>, vector<16x32xbf16>,
    %7 = vector.shape_cast %3 : vector<2x8x8xf32> to vector<2x8x8x1xf32>
    %c0_11 = arith.constant 0 : index
    %c0_12 = arith.constant 0 : index
    %8 = vector.load %arg25[%c0_11, %c0_12] : memref<16x64xbf16, #tpu.memory_space<vmem>>, vector<16x64xbf16>
    %c0_13 = arith.constant 0 : index
    %c0_14 = arith.constant 0 : index
    %c0_15 = arith.constant 0 : index
    %9 = vector.load %arg5[%c0_13, %c0_14, %c0_15] : memref<2x64x192xbf16, #tpu.memory_space<vmem>>, vector<1x64x192xbf16>
    %10 = vector.shape_cast %9 : vector<1x64x192xbf16> to vector<64x192xbf16>
    %cst_16 = arith.constant dense<0.000000e+00> : vector<16x192xf32>
    %11 = tpu.matmul %8, %10, %cst_16 {dimension_numbers = #tpu.dot_dimension_numbers<[1], [0], [0], [1], [0, 0, 1, 1], [], []>} : vector<16x64xbf16>, vector<64x192xbf16>, vector<16x192xf32> -> vector<16x192xf32>
    %12 = vector.extract_strided_slice %11 {offsets = [0, 0], sizes = [16, 64], strides = [1, 1]} : vector<16x192xf32> to vector<16x64xf32>
    %13 = vector.extract_strided_slice %11 {offsets = [0, 64], sizes = [16, 64], strides = [1, 1]} : vector<16x192xf32> to vector<16x64xf32>
    %14 = vector.extract_strided_slice %11 {offsets = [0, 128], sizes = [16, 64], strides = [1, 1]} : vector<16x192xf32> to vector<16x64xf32>
    %c0_17 = arith.constant 0 : index
    %c0_18 = arith.constant 0 : index
    %c0_19 = arith.constant 0 : index
    %15 = vector.load %arg7[%c0_17, %c0_18, %c0_19] : memref<2x1x64xf32, #tpu.memory_space<vmem>>, vector<1x1x64xf32>
    %16 = vector.shape_cast %15 : vector<1x1x64xf32> to vector<1x64xf32>
    %17 = vector.broadcast %16 : vector<1x64xf32> to vector<16x64xf32>
    %18 = arith.addf %14, %17 : vector<16x64xf32>
    %c0_20 = arith.constant 0 : index
    %c0_21 = arith.constant 0 : index
    %c0_22 = arith.constant 0 : index
    %19 = vector.load %arg8[%c0_20, %c0_21, %c0_22] : memref<2x32x64xbf16, #tpu.memory_space<vmem>>, vector<1x32x64xbf16>
    %20 = vector.shape_cast %19 : vector<1x32x64xbf16> to vector<32x64xbf16>
    %cst_23 = arith.constant dense<0.000000e+00> : vector<128x64xf32>
    %21 = tpu.matmul %1, %20, %cst_23 {dimension_numbers = #tpu.dot_dimension_numbers<[1], [0], [0], [1], [0, 0, 1, 1], [], []>} : vector<128x32xbf16>, vector<32x64xbf16>, vector<128x64xf32> -> vector<128x64xf32>
    %c0_24 = arith.constant 0 : index
    %c0_25 = arith.constant 0 : index
    %c0_26 = arith.constant 0 : index
    %22 = vector.load %arg9[%c0_24, %c0_25, %c0_26] : memref<2x32x64xbf16, #tpu.memory_space<vmem>>, vector<1x32x64xbf16>
    %23 = vector.shape_cast %22 : vector<1x32x64xbf16> to vector<32x64xbf16>
    %cst_27 = arith.constant dense<0.000000e+00> : vector<2x64xf32>
    %24 = tpu.matmul %2, %23, %cst_27 {dimension_numbers = #tpu.dot_dimension_numbers<[1], [0], [0], [1], [0, 0, 1, 1], [], []>} : vector<2x32xbf16>, vector<32x64xbf16>, vector<2x64xf32> -> vector<2x64xf32>
    %c0_28 = arith.constant 0 : index
    %c0_29 = arith.constant 0 : index
    %c0_30 = arith.constant 0 : index
    %25 = vector.load %arg6[%c0_28, %c0_29, %c0_30] : memref<2x1x64xf32, #tpu.memory_space<vmem>>, vector<1x1x64xf32>
    %26 = vector.shape_cast %25 : vector<1x1x64xf32> to vector<1x64xf32>
    %27 = vector.broadcast %26 : vector<1x64xf32> to vector<2x64xf32>
    %28 = arith.addf %24, %27 : vector<2x64xf32>
    %29 = vector.shape_cast %13 : vector<16x64xf32> to vector<2x8x64xf32>
    %30 = vector.shape_cast %28 : vector<2x64xf32> to vector<2x1x64xf32>
    %31 = vector.broadcast %30 : vector<2x1x64xf32> to vector<2x8x64xf32>
    %32 = arith.addf %29, %31 : vector<2x8x64xf32>
    %33 = vector.shape_cast %12 : vector<16x64xf32> to vector<2x1x8x64xf32>
    %34 = vector.shape_cast %32 : vector<2x8x64xf32> to vector<2x8x1x64xf32>
    %35 = vector.broadcast %33 : vector<2x1x8x64xf32> to vector<2x8x8x64xf32>
    %36 = vector.broadcast %34 : vector<2x8x1x64xf32> to vector<2x8x8x64xf32>
    %37 = arith.addf %35, %36 : vector<2x8x8x64xf32>
    %38 = vector.shape_cast %21 : vector<128x64xf32> to vector<2x8x8x64xf32>
    %39 = arith.addf %37, %38 : vector<2x8x8x64xf32>
    %cst_31 = arith.constant 0.000000e+00 : f32
    %40 = vector.broadcast %cst_31 : f32 to vector<2x8x8x64xf32>
    %41 = arith.maximumf %39, %40 : vector<2x8x8x64xf32>
    %42 = vector.shape_cast %41 : vector<2x8x8x64xf32> to vector<128x64xf32>
    %43 = arith.truncf %42 : vector<128x64xf32> to vector<128x64xbf16>
    %c0_32 = arith.constant 0 : index
    %c0_33 = arith.constant 0 : index
    %c0_34 = arith.constant 0 : index
    %44 = vector.load %arg10[%c0_32, %c0_33, %c0_34] : memref<2x64x64xbf16, #tpu.memory_space<vmem>>, vector<1x64x64xbf16>
    %45 = vector.shape_cast %44 : vector<1x64x64xbf16> to vector<64x64xbf16>
    %cst_35 = arith.constant dense<0.000000e+00> : vector<128x64xf32>
    %46 = tpu.matmul %43, %45, %cst_35 {dimension_numbers = #tpu.dot_dimension_numbers<[1], [0], [0], [1], [0, 0, 1, 1], [], []>} : vector<128x64xbf16>, vector<64x64xbf16>, vector<128x64xf32> -> vector<128x64xf32>
    %c0_36 = arith.constant 0 : index
    %c0_37 = arith.constant 0 : index
    %c0_38 = arith.constant 0 : index
    %47 = vector.load %arg11[%c0_36, %c0_37, %c0_38] : memref<2x1x64xf32, #tpu.memory_space<vmem>>, vector<1x1x64xf32>
    %48 = vector.shape_cast %47 : vector<1x1x64xf32> to vector<1x64xf32>
    %49 = vector.broadcast %48 : vector<1x64xf32> to vector<128x64xf32>
    %50 = arith.addf %46, %49 : vector<128x64xf32>
    %cst_39 = arith.constant 0.000000e+00 : f32
    %51 = vector.broadcast %cst_39 : f32 to vector<128x64xf32>
    %52 = arith.maximumf %50, %51 : vector<128x64xf32>
    %53 = arith.truncf %52 : vector<128x64xf32> to vector<128x64xbf16>
    %c0_40 = arith.constant 0 : index
    %c0_41 = arith.constant 0 : index
    %c0_42 = arith.constant 0 : index
    %54 = vector.load %arg12[%c0_40, %c0_41, %c0_42] : memref<2x64x64xbf16, #tpu.memory_space<vmem>>, vector<1x64x64xbf16>
    %55 = vector.shape_cast %54 : vector<1x64x64xbf16> to vector<64x64xbf16>
    %cst_43 = arith.constant dense<0.000000e+00> : vector<128x64xf32>
    %56 = tpu.matmul %53, %55, %cst_43 {dimension_numbers = #tpu.dot_dimension_numbers<[1], [0], [0], [1], [0, 0, 1, 1], [], []>} : vector<128x64xbf16>, vector<64x64xbf16>, vector<128x64xf32> -> vector<128x64xf32>
    %c0_44 = arith.constant 0 : index
    %c0_45 = arith.constant 0 : index
    %c0_46 = arith.constant 0 : index
    %57 = vector.load %arg13[%c0_44, %c0_45, %c0_46] : memref<2x1x64xf32, #tpu.memory_space<vmem>>, vector<1x1x64xf32>
    %58 = vector.shape_cast %57 : vector<1x1x64xf32> to vector<1x64xf32>
    %59 = vector.broadcast %58 : vector<1x64xf32> to vector<128x64xf32>
    %60 = arith.addf %56, %59 : vector<128x64xf32>
    %61 = vector.shape_cast %60 : vector<128x64xf32> to vector<2x8x8x64xf32>
    %62 = vector.broadcast %7 : vector<2x8x8x1xf32> to vector<2x8x8x64xf32>
    %63 = arith.addf %61, %62 : vector<2x8x8x64xf32>
    %cst_47 = arith.constant dense<0xFF800000> : vector<2x8x64xf32>
    %64 = vector.multi_reduction <maximumf>, %63, %cst_47 [1] : vector<2x8x8x64xf32> to vector<2x8x64xf32>
    %65 = vector.shape_cast %64 : vector<2x8x64xf32> to vector<16x64xf32>
    %66 = arith.truncf %65 : vector<16x64xf32> to vector<16x64xbf16>
    %c0_48 = arith.constant 0 : index
    %c0_49 = arith.constant 0 : index
    %c0_50 = arith.constant 0 : index
    %67 = vector.load %arg14[%c0_48, %c0_49, %c0_50] : memref<2x64x64xbf16, #tpu.memory_space<vmem>>, vector<1x64x64xbf16>
    %68 = vector.shape_cast %67 : vector<1x64x64xbf16> to vector<64x64xbf16>
    %cst_51 = arith.constant dense<0.000000e+00> : vector<16x64xf32>
    %69 = tpu.matmul %66, %68, %cst_51 {dimension_numbers = #tpu.dot_dimension_numbers<[1], [0], [0], [1], [0, 0, 1, 1], [], []>} : vector<16x64xbf16>, vector<64x64xbf16>, vector<16x64xf32> -> vector<16x64xf32>
    %c0_52 = arith.constant 0 : index
    %c0_53 = arith.constant 0 : index
    %c0_54 = arith.constant 0 : index
    %70 = vector.load %arg15[%c0_52, %c0_53, %c0_54] : memref<2x1x64xf32, #tpu.memory_space<vmem>>, vector<1x1x64xf32>
    %71 = vector.shape_cast %70 : vector<1x1x64xf32> to vector<1x64xf32>
    %72 = vector.broadcast %71 : vector<1x64xf32> to vector<16x64xf32>
    %73 = arith.addf %69, %72 : vector<16x64xf32>
    %74 = arith.addf %18, %73 : vector<16x64xf32>
    %cst_55 = arith.constant 0.000000e+00 : f32
    %75 = vector.broadcast %cst_55 : f32 to vector<16x64xf32>
    %76 = arith.maximumf %74, %75 : vector<16x64xf32>
    %77 = vector.extract_strided_slice %76 {offsets = [0, 0], sizes = [16, 32], strides = [1, 1]} : vector<16x64xf32> to vector<16x32xf32>
    %78 = vector.extract_strided_slice %76 {offsets = [0, 32], sizes = [16, 32], strides = [1, 1]} : vector<16x64xf32> to vector<16x32xf32>
    %cst_56 = arith.constant dense<0.000000e+00> : vector<16xf32>
    %79 = vector.multi_reduction <add>, %77, %cst_56 [1] : vector<16x32xf32> to vector<16xf32>
    %80 = vector.shape_cast %79 : vector<16xf32> to vector<16x1xf32>
    %cst_57 = arith.constant 3.200000e+01 : f32
    %81 = vector.broadcast %cst_57 : f32 to vector<16x1xf32>
    %82 = arith.divf %80, %81 : vector<16x1xf32>
    %cst_58 = arith.constant dense<0.000000e+00> : vector<16xf32>
    %83 = vector.multi_reduction <add>, %78, %cst_58 [1] : vector<16x32xf32> to vector<16xf32>
    %84 = vector.shape_cast %83 : vector<16xf32> to vector<16x1xf32>
    %cst_59 = arith.constant 3.200000e+01 : f32
    %85 = vector.broadcast %cst_59 : f32 to vector<16x1xf32>
    %86 = arith.divf %84, %85 : vector<16x1xf32>
    %87 = vector.broadcast %82 : vector<16x1xf32> to vector<16x32xf32>
    %88 = arith.subf %77, %87 : vector<16x32xf32>
    %89 = arith.mulf %88, %88 : vector<16x32xf32>
    %cst_60 = arith.constant dense<0.000000e+00> : vector<16xf32>
    %90 = vector.multi_reduction <add>, %89, %cst_60 [1] : vector<16x32xf32> to vector<16xf32>
    %91 = vector.shape_cast %90 : vector<16xf32> to vector<16x1xf32>
    %cst_61 = arith.constant 3.200000e+01 : f32
    %92 = vector.broadcast %cst_61 : f32 to vector<16x1xf32>
    %93 = arith.divf %91, %92 : vector<16x1xf32>
    %94 = vector.broadcast %86 : vector<16x1xf32> to vector<16x32xf32>
    %95 = arith.subf %78, %94 : vector<16x32xf32>
    %96 = arith.mulf %95, %95 : vector<16x32xf32>
    %cst_62 = arith.constant dense<0.000000e+00> : vector<16xf32>
    %97 = vector.multi_reduction <add>, %96, %cst_62 [1] : vector<16x32xf32> to vector<16xf32>
    %98 = vector.shape_cast %97 : vector<16xf32> to vector<16x1xf32>
    %cst_63 = arith.constant 3.200000e+01 : f32
    %99 = vector.broadcast %cst_63 : f32 to vector<16x1xf32>
    %100 = arith.divf %98, %99 : vector<16x1xf32>
    %101 = vector.broadcast %82 : vector<16x1xf32> to vector<16x32xf32>
    %102 = arith.subf %77, %101 : vector<16x32xf32>
    %cst_64 = arith.constant 9.99999974E-6 : f32
    %103 = vector.broadcast %cst_64 : f32 to vector<16x1xf32>
    %104 = arith.addf %93, %103 : vector<16x1xf32>
    %105 = math.rsqrt %104 : vector<16x1xf32>
    %106 = vector.broadcast %105 : vector<16x1xf32> to vector<16x32xf32>
    %107 = arith.mulf %102, %106 : vector<16x32xf32>
    %108 = vector.broadcast %86 : vector<16x1xf32> to vector<16x32xf32>
    %109 = arith.subf %78, %108 : vector<16x32xf32>
    %cst_65 = arith.constant 9.99999974E-6 : f32
    %110 = vector.broadcast %cst_65 : f32 to vector<16x1xf32>
    %111 = arith.addf %100, %110 : vector<16x1xf32>
    %112 = math.rsqrt %111 : vector<16x1xf32>
    %113 = vector.broadcast %112 : vector<16x1xf32> to vector<16x32xf32>
    %114 = arith.mulf %109, %113 : vector<16x32xf32>
    %115 = tpu.concatenate %107, %114 in 1 : vector<16x32xf32>, vector<16x32xf32> -> vector<16x64xf32>
    %c0_66 = arith.constant 0 : index
    %c0_67 = arith.constant 0 : index
    %c0_68 = arith.constant 0 : index
    %116 = vector.load %arg16[%c0_66, %c0_67, %c0_68] : memref<2x1x64xf32, #tpu.memory_space<vmem>>, vector<1x1x64xf32>
    %117 = vector.shape_cast %116 : vector<1x1x64xf32> to vector<1x64xf32>
    %118 = vector.broadcast %117 : vector<1x64xf32> to vector<16x64xf32>
    %119 = arith.mulf %115, %118 : vector<16x64xf32>
    %c0_69 = arith.constant 0 : index
    %c0_70 = arith.constant 0 : index
    %c0_71 = arith.constant 0 : index
    %120 = vector.load %arg17[%c0_69, %c0_70, %c0_71] : memref<2x1x64xf32, #tpu.memory_space<vmem>>, vector<1x1x64xf32>
    %121 = vector.shape_cast %120 : vector<1x1x64xf32> to vector<1x64xf32>
    %122 = vector.broadcast %121 : vector<1x64xf32> to vector<16x64xf32>
    %123 = arith.addf %119, %122 : vector<16x64xf32>
    %124 = arith.truncf %123 : vector<16x64xf32> to vector<16x64xbf16>
    %c0_72 = arith.constant 0 : index
    %c0_73 = arith.constant 0 : index
    %c0_74 = arith.constant 0 : index
    %125 = vector.load %arg18[%c0_72, %c0_73, %c0_74] : memref<2x64x32xbf16, #tpu.memory_space<vmem>>, vector<1x64x32xbf16>
    %126 = vector.shape_cast %125 : vector<1x64x32xbf16> to vector<64x32xbf16>
    %cst_75 = arith.constant dense<0.000000e+00> : vector<16x32xf32>
    %127 = tpu.matmul %124, %126, %cst_75 {dimension_numbers = #tpu.dot_dimension_numbers<[1], [0], [0], [1], [0, 0, 1, 1], [], []>} : vector<16x64xbf16>, vector<64x32xbf16>, vector<16x32xf32> -> vector<16x32xf32>
    %c0_76 = arith.constant 0 : index
    %c0_77 = arith.constant 0 : index
    %c0_78 = arith.constant 0 : index
    %128 = vector.load %arg19[%c0_76, %c0_77, %c0_78] : memref<2x1x32xf32, #tpu.memory_space<vmem>>, vector<1x1x32xf32>
    %129 = vector.shape_cast %128 : vector<1x1x32xf32> to vector<1x32xf32>
    %130 = vector.broadcast %129 : vector<1x32xf32> to vector<16x32xf32>
    %131 = arith.addf %127, %130 : vector<16x32xf32>
    %cst_79 = arith.constant 0.000000e+00 : f32
    %132 = vector.broadcast %cst_79 : f32 to vector<16x32xf32>
    %133 = arith.maximumf %131, %132 : vector<16x32xf32>
    %134 = arith.truncf %133 : vector<16x32xf32> to vector<16x32xbf16>
    %c0_80 = arith.constant 0 : index
    %c32_81 = arith.constant 32 : index
    %135 = vector.load %arg25[%c0_80, %c32_81] : memref<16x64xbf16, #tpu.memory_space<vmem>>, vector<16x32xbf16>
    tpu.vector_store %arg25[%c0_80, %c32_81], %134 {strides = array<i32>} : memref<16x64xbf16, #tpu.memory_space<vmem>>, vector<16x32xbf16>,
    %c0_82 = arith.constant 0 : index
    %c0_83 = arith.constant 0 : index
    %136 = vector.load %arg25[%c0_82, %c0_83] : memref<16x64xbf16, #tpu.memory_space<vmem>>, vector<16x64xbf16>
    %c1 = arith.constant 1 : index
    %c0_84 = arith.constant 0 : index
    %c0_85 = arith.constant 0 : index
    %137 = vector.load %arg5[%c1, %c0_84, %c0_85] : memref<2x64x192xbf16, #tpu.memory_space<vmem>>, vector<1x64x192xbf16>
    %138 = vector.shape_cast %137 : vector<1x64x192xbf16> to vector<64x192xbf16>
    %cst_86 = arith.constant dense<0.000000e+00> : vector<16x192xf32>
    %139 = tpu.matmul %136, %138, %cst_86 {dimension_numbers = #tpu.dot_dimension_numbers<[1], [0], [0], [1], [0, 0, 1, 1], [], []>} : vector<16x64xbf16>, vector<64x192xbf16>, vector<16x192xf32> -> vector<16x192xf32>
    %140 = vector.extract_strided_slice %139 {offsets = [0, 0], sizes = [16, 64], strides = [1, 1]} : vector<16x192xf32> to vector<16x64xf32>
    %141 = vector.extract_strided_slice %139 {offsets = [0, 64], sizes = [16, 64], strides = [1, 1]} : vector<16x192xf32> to vector<16x64xf32>
    %142 = vector.extract_strided_slice %139 {offsets = [0, 128], sizes = [16, 64], strides = [1, 1]} : vector<16x192xf32> to vector<16x64xf32>
    %c1_87 = arith.constant 1 : index
    %c0_88 = arith.constant 0 : index
    %c0_89 = arith.constant 0 : index
    %143 = vector.load %arg7[%c1_87, %c0_88, %c0_89] : memref<2x1x64xf32, #tpu.memory_space<vmem>>, vector<1x1x64xf32>
    %144 = vector.shape_cast %143 : vector<1x1x64xf32> to vector<1x64xf32>
    %145 = vector.broadcast %144 : vector<1x64xf32> to vector<16x64xf32>
    %146 = arith.addf %142, %145 : vector<16x64xf32>
    %c1_90 = arith.constant 1 : index
    %c0_91 = arith.constant 0 : index
    %c0_92 = arith.constant 0 : index
    %147 = vector.load %arg8[%c1_90, %c0_91, %c0_92] : memref<2x32x64xbf16, #tpu.memory_space<vmem>>, vector<1x32x64xbf16>
    %148 = vector.shape_cast %147 : vector<1x32x64xbf16> to vector<32x64xbf16>
    %cst_93 = arith.constant dense<0.000000e+00> : vector<128x64xf32>
    %149 = tpu.matmul %1, %148, %cst_93 {dimension_numbers = #tpu.dot_dimension_numbers<[1], [0], [0], [1], [0, 0, 1, 1], [], []>} : vector<128x32xbf16>, vector<32x64xbf16>, vector<128x64xf32> -> vector<128x64xf32>
    %c1_94 = arith.constant 1 : index
    %c0_95 = arith.constant 0 : index
    %c0_96 = arith.constant 0 : index
    %150 = vector.load %arg9[%c1_94, %c0_95, %c0_96] : memref<2x32x64xbf16, #tpu.memory_space<vmem>>, vector<1x32x64xbf16>
    %151 = vector.shape_cast %150 : vector<1x32x64xbf16> to vector<32x64xbf16>
    %cst_97 = arith.constant dense<0.000000e+00> : vector<2x64xf32>
    %152 = tpu.matmul %2, %151, %cst_97 {dimension_numbers = #tpu.dot_dimension_numbers<[1], [0], [0], [1], [0, 0, 1, 1], [], []>} : vector<2x32xbf16>, vector<32x64xbf16>, vector<2x64xf32> -> vector<2x64xf32>
    %c1_98 = arith.constant 1 : index
    %c0_99 = arith.constant 0 : index
    %c0_100 = arith.constant 0 : index
    %153 = vector.load %arg6[%c1_98, %c0_99, %c0_100] : memref<2x1x64xf32, #tpu.memory_space<vmem>>, vector<1x1x64xf32>
    %154 = vector.shape_cast %153 : vector<1x1x64xf32> to vector<1x64xf32>
    %155 = vector.broadcast %154 : vector<1x64xf32> to vector<2x64xf32>
    %156 = arith.addf %152, %155 : vector<2x64xf32>
    %157 = vector.shape_cast %141 : vector<16x64xf32> to vector<2x8x64xf32>
    %158 = vector.shape_cast %156 : vector<2x64xf32> to vector<2x1x64xf32>
    %159 = vector.broadcast %158 : vector<2x1x64xf32> to vector<2x8x64xf32>
    %160 = arith.addf %157, %159 : vector<2x8x64xf32>
    %161 = vector.shape_cast %140 : vector<16x64xf32> to vector<2x1x8x64xf32>
    %162 = vector.shape_cast %160 : vector<2x8x64xf32> to vector<2x8x1x64xf32>
    %163 = vector.broadcast %161 : vector<2x1x8x64xf32> to vector<2x8x8x64xf32>
    %164 = vector.broadcast %162 : vector<2x8x1x64xf32> to vector<2x8x8x64xf32>
    %165 = arith.addf %163, %164 : vector<2x8x8x64xf32>
    %166 = vector.shape_cast %149 : vector<128x64xf32> to vector<2x8x8x64xf32>
    %167 = arith.addf %165, %166 : vector<2x8x8x64xf32>
    %cst_101 = arith.constant 0.000000e+00 : f32
    %168 = vector.broadcast %cst_101 : f32 to vector<2x8x8x64xf32>
    %169 = arith.maximumf %167, %168 : vector<2x8x8x64xf32>
    %170 = vector.shape_cast %169 : vector<2x8x8x64xf32> to vector<128x64xf32>
    %171 = arith.truncf %170 : vector<128x64xf32> to vector<128x64xbf16>
    %c1_102 = arith.constant 1 : index
    %c0_103 = arith.constant 0 : index
    %c0_104 = arith.constant 0 : index
    %172 = vector.load %arg10[%c1_102, %c0_103, %c0_104] : memref<2x64x64xbf16, #tpu.memory_space<vmem>>, vector<1x64x64xbf16>
    %173 = vector.shape_cast %172 : vector<1x64x64xbf16> to vector<64x64xbf16>
    %cst_105 = arith.constant dense<0.000000e+00> : vector<128x64xf32>
    %174 = tpu.matmul %171, %173, %cst_105 {dimension_numbers = #tpu.dot_dimension_numbers<[1], [0], [0], [1], [0, 0, 1, 1], [], []>} : vector<128x64xbf16>, vector<64x64xbf16>, vector<128x64xf32> -> vector<128x64xf32>
    %c1_106 = arith.constant 1 : index
    %c0_107 = arith.constant 0 : index
    %c0_108 = arith.constant 0 : index
    %175 = vector.load %arg11[%c1_106, %c0_107, %c0_108] : memref<2x1x64xf32, #tpu.memory_space<vmem>>, vector<1x1x64xf32>
    %176 = vector.shape_cast %175 : vector<1x1x64xf32> to vector<1x64xf32>
    %177 = vector.broadcast %176 : vector<1x64xf32> to vector<128x64xf32>
    %178 = arith.addf %174, %177 : vector<128x64xf32>
    %cst_109 = arith.constant 0.000000e+00 : f32
    %179 = vector.broadcast %cst_109 : f32 to vector<128x64xf32>
    %180 = arith.maximumf %178, %179 : vector<128x64xf32>
    %181 = arith.truncf %180 : vector<128x64xf32> to vector<128x64xbf16>
    %c1_110 = arith.constant 1 : index
    %c0_111 = arith.constant 0 : index
    %c0_112 = arith.constant 0 : index
    %182 = vector.load %arg12[%c1_110, %c0_111, %c0_112] : memref<2x64x64xbf16, #tpu.memory_space<vmem>>, vector<1x64x64xbf16>
    %183 = vector.shape_cast %182 : vector<1x64x64xbf16> to vector<64x64xbf16>
    %cst_113 = arith.constant dense<0.000000e+00> : vector<128x64xf32>
    %184 = tpu.matmul %181, %183, %cst_113 {dimension_numbers = #tpu.dot_dimension_numbers<[1], [0], [0], [1], [0, 0, 1, 1], [], []>} : vector<128x64xbf16>, vector<64x64xbf16>, vector<128x64xf32> -> vector<128x64xf32>
    %c1_114 = arith.constant 1 : index
    %c0_115 = arith.constant 0 : index
    %c0_116 = arith.constant 0 : index
    %185 = vector.load %arg13[%c1_114, %c0_115, %c0_116] : memref<2x1x64xf32, #tpu.memory_space<vmem>>, vector<1x1x64xf32>
    %186 = vector.shape_cast %185 : vector<1x1x64xf32> to vector<1x64xf32>
    %187 = vector.broadcast %186 : vector<1x64xf32> to vector<128x64xf32>
    %188 = arith.addf %184, %187 : vector<128x64xf32>
    %189 = vector.shape_cast %188 : vector<128x64xf32> to vector<2x8x8x64xf32>
    %190 = vector.broadcast %7 : vector<2x8x8x1xf32> to vector<2x8x8x64xf32>
    %191 = arith.addf %189, %190 : vector<2x8x8x64xf32>
    %cst_117 = arith.constant dense<0xFF800000> : vector<2x8x64xf32>
    %192 = vector.multi_reduction <maximumf>, %191, %cst_117 [1] : vector<2x8x8x64xf32> to vector<2x8x64xf32>
    %193 = vector.shape_cast %192 : vector<2x8x64xf32> to vector<16x64xf32>
    %194 = arith.truncf %193 : vector<16x64xf32> to vector<16x64xbf16>
    %c1_118 = arith.constant 1 : index
    %c0_119 = arith.constant 0 : index
    %c0_120 = arith.constant 0 : index
    %195 = vector.load %arg14[%c1_118, %c0_119, %c0_120] : memref<2x64x64xbf16, #tpu.memory_space<vmem>>, vector<1x64x64xbf16>
    %196 = vector.shape_cast %195 : vector<1x64x64xbf16> to vector<64x64xbf16>
    %cst_121 = arith.constant dense<0.000000e+00> : vector<16x64xf32>
    %197 = tpu.matmul %194, %196, %cst_121 {dimension_numbers = #tpu.dot_dimension_numbers<[1], [0], [0], [1], [0, 0, 1, 1], [], []>} : vector<16x64xbf16>, vector<64x64xbf16>, vector<16x64xf32> -> vector<16x64xf32>
    %c1_122 = arith.constant 1 : index
    %c0_123 = arith.constant 0 : index
    %c0_124 = arith.constant 0 : index
    %198 = vector.load %arg15[%c1_122, %c0_123, %c0_124] : memref<2x1x64xf32, #tpu.memory_space<vmem>>, vector<1x1x64xf32>
    %199 = vector.shape_cast %198 : vector<1x1x64xf32> to vector<1x64xf32>
    %200 = vector.broadcast %199 : vector<1x64xf32> to vector<16x64xf32>
    %201 = arith.addf %197, %200 : vector<16x64xf32>
    %202 = arith.addf %146, %201 : vector<16x64xf32>
    %cst_125 = arith.constant 0.000000e+00 : f32
    %203 = vector.broadcast %cst_125 : f32 to vector<16x64xf32>
    %204 = arith.maximumf %202, %203 : vector<16x64xf32>
    %205 = vector.extract_strided_slice %204 {offsets = [0, 0], sizes = [16, 32], strides = [1, 1]} : vector<16x64xf32> to vector<16x32xf32>
    %206 = vector.extract_strided_slice %204 {offsets = [0, 32], sizes = [16, 32], strides = [1, 1]} : vector<16x64xf32> to vector<16x32xf32>
    %cst_126 = arith.constant dense<0.000000e+00> : vector<16xf32>
    %207 = vector.multi_reduction <add>, %205, %cst_126 [1] : vector<16x32xf32> to vector<16xf32>
    %208 = vector.shape_cast %207 : vector<16xf32> to vector<16x1xf32>
    %cst_127 = arith.constant 3.200000e+01 : f32
    %209 = vector.broadcast %cst_127 : f32 to vector<16x1xf32>
    %210 = arith.divf %208, %209 : vector<16x1xf32>
    %cst_128 = arith.constant dense<0.000000e+00> : vector<16xf32>
    %211 = vector.multi_reduction <add>, %206, %cst_128 [1] : vector<16x32xf32> to vector<16xf32>
    %212 = vector.shape_cast %211 : vector<16xf32> to vector<16x1xf32>
    %cst_129 = arith.constant 3.200000e+01 : f32
    %213 = vector.broadcast %cst_129 : f32 to vector<16x1xf32>
    %214 = arith.divf %212, %213 : vector<16x1xf32>
    %215 = vector.broadcast %210 : vector<16x1xf32> to vector<16x32xf32>
    %216 = arith.subf %205, %215 : vector<16x32xf32>
    %217 = arith.mulf %216, %216 : vector<16x32xf32>
    %cst_130 = arith.constant dense<0.000000e+00> : vector<16xf32>
    %218 = vector.multi_reduction <add>, %217, %cst_130 [1] : vector<16x32xf32> to vector<16xf32>
    %219 = vector.shape_cast %218 : vector<16xf32> to vector<16x1xf32>
    %cst_131 = arith.constant 3.200000e+01 : f32
    %220 = vector.broadcast %cst_131 : f32 to vector<16x1xf32>
    %221 = arith.divf %219, %220 : vector<16x1xf32>
    %222 = vector.broadcast %214 : vector<16x1xf32> to vector<16x32xf32>
    %223 = arith.subf %206, %222 : vector<16x32xf32>
    %224 = arith.mulf %223, %223 : vector<16x32xf32>
    %cst_132 = arith.constant dense<0.000000e+00> : vector<16xf32>
    %225 = vector.multi_reduction <add>, %224, %cst_132 [1] : vector<16x32xf32> to vector<16xf32>
    %226 = vector.shape_cast %225 : vector<16xf32> to vector<16x1xf32>
    %cst_133 = arith.constant 3.200000e+01 : f32
    %227 = vector.broadcast %cst_133 : f32 to vector<16x1xf32>
    %228 = arith.divf %226, %227 : vector<16x1xf32>
    %229 = vector.broadcast %210 : vector<16x1xf32> to vector<16x32xf32>
    %230 = arith.subf %205, %229 : vector<16x32xf32>
    %cst_134 = arith.constant 9.99999974E-6 : f32
    %231 = vector.broadcast %cst_134 : f32 to vector<16x1xf32>
    %232 = arith.addf %221, %231 : vector<16x1xf32>
    %233 = math.rsqrt %232 : vector<16x1xf32>
    %234 = vector.broadcast %233 : vector<16x1xf32> to vector<16x32xf32>
    %235 = arith.mulf %230, %234 : vector<16x32xf32>
    %236 = vector.broadcast %214 : vector<16x1xf32> to vector<16x32xf32>
    %237 = arith.subf %206, %236 : vector<16x32xf32>
    %cst_135 = arith.constant 9.99999974E-6 : f32
    %238 = vector.broadcast %cst_135 : f32 to vector<16x1xf32>
    %239 = arith.addf %228, %238 : vector<16x1xf32>
    %240 = math.rsqrt %239 : vector<16x1xf32>
    %241 = vector.broadcast %240 : vector<16x1xf32> to vector<16x32xf32>
    %242 = arith.mulf %237, %241 : vector<16x32xf32>
    %243 = tpu.concatenate %235, %242 in 1 : vector<16x32xf32>, vector<16x32xf32> -> vector<16x64xf32>
    %c1_136 = arith.constant 1 : index
    %c0_137 = arith.constant 0 : index
    %c0_138 = arith.constant 0 : index
    %244 = vector.load %arg16[%c1_136, %c0_137, %c0_138] : memref<2x1x64xf32, #tpu.memory_space<vmem>>, vector<1x1x64xf32>
    %245 = vector.shape_cast %244 : vector<1x1x64xf32> to vector<1x64xf32>
    %246 = vector.broadcast %245 : vector<1x64xf32> to vector<16x64xf32>
    %247 = arith.mulf %243, %246 : vector<16x64xf32>
    %c1_139 = arith.constant 1 : index
    %c0_140 = arith.constant 0 : index
    %c0_141 = arith.constant 0 : index
    %248 = vector.load %arg17[%c1_139, %c0_140, %c0_141] : memref<2x1x64xf32, #tpu.memory_space<vmem>>, vector<1x1x64xf32>
    %249 = vector.shape_cast %248 : vector<1x1x64xf32> to vector<1x64xf32>
    %250 = vector.broadcast %249 : vector<1x64xf32> to vector<16x64xf32>
    %251 = arith.addf %247, %250 : vector<16x64xf32>
    %252 = arith.truncf %251 : vector<16x64xf32> to vector<16x64xbf16>
    %c1_142 = arith.constant 1 : index
    %c0_143 = arith.constant 0 : index
    %c0_144 = arith.constant 0 : index
    %253 = vector.load %arg18[%c1_142, %c0_143, %c0_144] : memref<2x64x32xbf16, #tpu.memory_space<vmem>>, vector<1x64x32xbf16>
    %254 = vector.shape_cast %253 : vector<1x64x32xbf16> to vector<64x32xbf16>
    %cst_145 = arith.constant dense<0.000000e+00> : vector<16x32xf32>
    %255 = tpu.matmul %252, %254, %cst_145 {dimension_numbers = #tpu.dot_dimension_numbers<[1], [0], [0], [1], [0, 0, 1, 1], [], []>} : vector<16x64xbf16>, vector<64x32xbf16>, vector<16x32xf32> -> vector<16x32xf32>
    %c1_146 = arith.constant 1 : index
    %c0_147 = arith.constant 0 : index
    %c0_148 = arith.constant 0 : index
    %256 = vector.load %arg19[%c1_146, %c0_147, %c0_148] : memref<2x1x32xf32, #tpu.memory_space<vmem>>, vector<1x1x32xf32>
    %257 = vector.shape_cast %256 : vector<1x1x32xf32> to vector<1x32xf32>
    %258 = vector.broadcast %257 : vector<1x32xf32> to vector<16x32xf32>
    %259 = arith.addf %255, %258 : vector<16x32xf32>
    %cst_149 = arith.constant 0.000000e+00 : f32
    %260 = vector.broadcast %cst_149 : f32 to vector<16x32xf32>
    %261 = arith.maximumf %259, %260 : vector<16x32xf32>
    %262 = arith.truncf %261 : vector<16x32xf32> to vector<16x32xbf16>
    %c0_150 = arith.constant 0 : index
    %c32_151 = arith.constant 32 : index
    %263 = vector.load %arg25[%c0_150, %c32_151] : memref<16x64xbf16, #tpu.memory_space<vmem>>, vector<16x32xbf16>
    tpu.vector_store %arg25[%c0_150, %c32_151], %262 {strides = array<i32>} : memref<16x64xbf16, #tpu.memory_space<vmem>>, vector<16x32xbf16>,
    %264 = vector.shape_cast %261 : vector<16x32xf32> to vector<2x8x32xf32>
    %cst_152 = arith.constant dense<0.000000e+00> : vector<2x32xf32>
    %265 = vector.multi_reduction <add>, %264, %cst_152 [1] : vector<2x8x32xf32> to vector<2x32xf32>
    %cst_153 = arith.constant 8.000000e+00 : f32
    %266 = vector.broadcast %cst_153 : f32 to vector<2x32xf32>
    %267 = arith.divf %265, %266 : vector<2x32xf32>
    %268 = arith.truncf %267 : vector<2x32xf32> to vector<2x32xbf16>
    %c0_154 = arith.constant 0 : index
    %c0_155 = arith.constant 0 : index
    %269 = vector.load %arg20[%c0_154, %c0_155] : memref<32x32xbf16, #tpu.memory_space<vmem>>, vector<32x32xbf16>
    %cst_156 = arith.constant dense<0.000000e+00> : vector<2x32xf32>
    %270 = tpu.matmul %268, %269, %cst_156 {dimension_numbers = #tpu.dot_dimension_numbers<[1], [0], [0], [1], [0, 0, 1, 1], [], []>} : vector<2x32xbf16>, vector<32x32xbf16>, vector<2x32xf32> -> vector<2x32xf32>
    %c0_157 = arith.constant 0 : index
    %c0_158 = arith.constant 0 : index
    %271 = vector.load %arg21[%c0_157, %c0_158] : memref<1x32xf32, #tpu.memory_space<vmem>>, vector<1x32xf32>
    %272 = vector.broadcast %271 : vector<1x32xf32> to vector<2x32xf32>
    %273 = arith.addf %270, %272 : vector<2x32xf32>
    %cst_159 = arith.constant 0.000000e+00 : f32
    %274 = vector.broadcast %cst_159 : f32 to vector<2x32xf32>
    %275 = arith.maximumf %273, %274 : vector<2x32xf32>
    %276 = arith.truncf %275 : vector<2x32xf32> to vector<2x32xbf16>
    %c0_160 = arith.constant 0 : index
    %c0_161 = arith.constant 0 : index
    %277 = vector.load %arg22[%c0_160, %c0_161] : memref<32x16xbf16, #tpu.memory_space<vmem>>, vector<32x16xbf16>
    %cst_162 = arith.constant dense<0.000000e+00> : vector<2x16xf32>
    %278 = tpu.matmul %276, %277, %cst_162 {dimension_numbers = #tpu.dot_dimension_numbers<[1], [0], [0], [1], [0, 0, 1, 1], [], []>} : vector<2x32xbf16>, vector<32x16xbf16>, vector<2x16xf32> -> vector<2x16xf32>
    %c0_163 = arith.constant 0 : index
    %c0_164 = arith.constant 0 : index
    %279 = vector.load %arg23[%c0_163, %c0_164] : memref<1x16xf32, #tpu.memory_space<vmem>>, vector<1x16xf32>
    %280 = vector.broadcast %279 : vector<1x16xf32> to vector<2x16xf32>
    %281 = arith.addf %278, %280 : vector<2x16xf32>
    %c0_165 = arith.constant 0 : index
    %c0_166 = arith.constant 0 : index
    %282 = vector.load %arg24[%c0_165, %c0_166] : memref<2x16xf32, #tpu.memory_space<vmem>>, vector<2x16xf32>
    tpu.vector_store %arg24[%c0_165, %c0_166], %281 {strides = array<i32>} : memref<2x16xf32, #tpu.memory_space<vmem>>, vector<2x16xf32>,
    return
  }
  func.func @transform_0(%arg0: i32) -> (i32, i32) {
    %c0_i32 = arith.constant 0 : i32
    %c0_i32_0 = arith.constant 0 : i32
    %c0_i32_1 = arith.constant 0 : i32
    return %c0_i32, %c0_i32_0 : i32, i32
  }
  func.func @transform_1(%arg0: i32) -> (i32, i32) {
    %c0_i32 = arith.constant 0 : i32
    %c0_i32_0 = arith.constant 0 : i32
    %c0_i32_1 = arith.constant 0 : i32
    return %c0_i32, %c0_i32_0 : i32, i32
  }
  func.func @transform_2(%arg0: i32) -> (i32, i32) {
    %c0_i32 = arith.constant 0 : i32
    %c0_i32_0 = arith.constant 0 : i32
    %c0_i32_1 = arith.constant 0 : i32
    return %c0_i32, %c0_i32_0 : i32, i32
  }
  func.func @transform_3(%arg0: i32) -> (i32, i32, i32) {
    %c0_i32 = arith.constant 0 : i32
    %c0_i32_0 = arith.constant 0 : i32
    %c0_i32_1 = arith.constant 0 : i32
    %c0_i32_2 = arith.constant 0 : i32
    return %c0_i32, %c0_i32_0, %c0_i32_1 : i32, i32, i32
  }
  func.func @transform_4(%arg0: i32) -> (i32, i32, i32) {
    %c0_i32 = arith.constant 0 : i32
    %c0_i32_0 = arith.constant 0 : i32
    %c0_i32_1 = arith.constant 0 : i32
    %c0_i32_2 = arith.constant 0 : i32
    return %c0_i32, %c0_i32_0, %c0_i32_1 : i32, i32, i32
  }
  func.func @transform_5(%arg0: i32) -> (i32, i32, i32) {
    %c0_i32 = arith.constant 0 : i32
    %c0_i32_0 = arith.constant 0 : i32
    %c0_i32_1 = arith.constant 0 : i32
    %c0_i32_2 = arith.constant 0 : i32
    return %c0_i32, %c0_i32_0, %c0_i32_1 : i32, i32, i32
  }
  func.func @transform_6(%arg0: i32) -> (i32, i32, i32) {
    %c0_i32 = arith.constant 0 : i32
    %c0_i32_0 = arith.constant 0 : i32
    %c0_i32_1 = arith.constant 0 : i32
    %c0_i32_2 = arith.constant 0 : i32
    return %c0_i32, %c0_i32_0, %c0_i32_1 : i32, i32, i32
  }
  func.func @transform_7(%arg0: i32) -> (i32, i32, i32) {
    %c0_i32 = arith.constant 0 : i32
    %c0_i32_0 = arith.constant 0 : i32
    %c0_i32_1 = arith.constant 0 : i32
    %c0_i32_2 = arith.constant 0 : i32
    return %c0_i32, %c0_i32_0, %c0_i32_1 : i32, i32, i32
  }
  func.func @transform_8(%arg0: i32) -> (i32, i32, i32) {
    %c0_i32 = arith.constant 0 : i32
    %c0_i32_0 = arith.constant 0 : i32
    %c0_i32_1 = arith.constant 0 : i32
    %c0_i32_2 = arith.constant 0 : i32
    return %c0_i32, %c0_i32_0, %c0_i32_1 : i32, i32, i32
  }
  func.func @transform_9(%arg0: i32) -> (i32, i32, i32) {
    %c0_i32 = arith.constant 0 : i32
    %c0_i32_0 = arith.constant 0 : i32
    %c0_i32_1 = arith.constant 0 : i32
    %c0_i32_2 = arith.constant 0 : i32
    return %c0_i32, %c0_i32_0, %c0_i32_1 : i32, i32, i32
  }
  func.func @transform_10(%arg0: i32) -> (i32, i32, i32) {
    %c0_i32 = arith.constant 0 : i32
    %c0_i32_0 = arith.constant 0 : i32
    %c0_i32_1 = arith.constant 0 : i32
    %c0_i32_2 = arith.constant 0 : i32
    return %c0_i32, %c0_i32_0, %c0_i32_1 : i32, i32, i32
  }
  func.func @transform_11(%arg0: i32) -> (i32, i32, i32) {
    %c0_i32 = arith.constant 0 : i32
    %c0_i32_0 = arith.constant 0 : i32
    %c0_i32_1 = arith.constant 0 : i32
    %c0_i32_2 = arith.constant 0 : i32
    return %c0_i32, %c0_i32_0, %c0_i32_1 : i32, i32, i32
  }
  func.func @transform_12(%arg0: i32) -> (i32, i32, i32) {
    %c0_i32 = arith.constant 0 : i32
    %c0_i32_0 = arith.constant 0 : i32
    %c0_i32_1 = arith.constant 0 : i32
    %c0_i32_2 = arith.constant 0 : i32
    return %c0_i32, %c0_i32_0, %c0_i32_1 : i32, i32, i32
  }
  func.func @transform_13(%arg0: i32) -> (i32, i32, i32) {
    %c0_i32 = arith.constant 0 : i32
    %c0_i32_0 = arith.constant 0 : i32
    %c0_i32_1 = arith.constant 0 : i32
    %c0_i32_2 = arith.constant 0 : i32
    return %c0_i32, %c0_i32_0, %c0_i32_1 : i32, i32, i32
  }
  func.func @transform_14(%arg0: i32) -> (i32, i32, i32) {
    %c0_i32 = arith.constant 0 : i32
    %c0_i32_0 = arith.constant 0 : i32
    %c0_i32_1 = arith.constant 0 : i32
    %c0_i32_2 = arith.constant 0 : i32
    return %c0_i32, %c0_i32_0, %c0_i32_1 : i32, i32, i32
  }
  func.func @transform_15(%arg0: i32) -> (i32, i32, i32) {
    %c0_i32 = arith.constant 0 : i32
    %c0_i32_0 = arith.constant 0 : i32
    %c0_i32_1 = arith.constant 0 : i32
    %c0_i32_2 = arith.constant 0 : i32
    return %c0_i32, %c0_i32_0, %c0_i32_1 : i32, i32, i32
  }
  func.func @transform_16(%arg0: i32) -> (i32, i32, i32) {
    %c0_i32 = arith.constant 0 : i32
    %c0_i32_0 = arith.constant 0 : i32
    %c0_i32_1 = arith.constant 0 : i32
    %c0_i32_2 = arith.constant 0 : i32
    return %c0_i32, %c0_i32_0, %c0_i32_1 : i32, i32, i32
  }
  func.func @transform_17(%arg0: i32) -> (i32, i32, i32) {
    %c0_i32 = arith.constant 0 : i32
    %c0_i32_0 = arith.constant 0 : i32
    %c0_i32_1 = arith.constant 0 : i32
    %c0_i32_2 = arith.constant 0 : i32
    return %c0_i32, %c0_i32_0, %c0_i32_1 : i32, i32, i32
  }
  func.func @transform_18(%arg0: i32) -> (i32, i32, i32) {
    %c0_i32 = arith.constant 0 : i32
    %c0_i32_0 = arith.constant 0 : i32
    %c0_i32_1 = arith.constant 0 : i32
    %c0_i32_2 = arith.constant 0 : i32
    return %c0_i32, %c0_i32_0, %c0_i32_1 : i32, i32, i32
  }
  func.func @transform_19(%arg0: i32) -> (i32, i32) {
    %c0_i32 = arith.constant 0 : i32
    %c0_i32_0 = arith.constant 0 : i32
    %c0_i32_1 = arith.constant 0 : i32
    return %c0_i32, %c0_i32_0 : i32, i32
  }
  func.func @transform_20(%arg0: i32) -> (i32, i32) {
    %c0_i32 = arith.constant 0 : i32
    %c0_i32_0 = arith.constant 0 : i32
    %c0_i32_1 = arith.constant 0 : i32
    return %c0_i32, %c0_i32_0 : i32, i32
  }
  func.func @transform_21(%arg0: i32) -> (i32, i32) {
    %c0_i32 = arith.constant 0 : i32
    %c0_i32_0 = arith.constant 0 : i32
    %c0_i32_1 = arith.constant 0 : i32
    return %c0_i32, %c0_i32_0 : i32, i32
  }
  func.func @transform_22(%arg0: i32) -> (i32, i32) {
    %c0_i32 = arith.constant 0 : i32
    %c0_i32_0 = arith.constant 0 : i32
    %c0_i32_1 = arith.constant 0 : i32
    return %c0_i32, %c0_i32_0 : i32, i32
  }
  func.func @transform_23(%arg0: i32) -> (i32, i32) {
    %c0_i32 = arith.constant 0 : i32
    %c0_i32_0 = arith.constant 0 : i32
    %c0_i32_1 = arith.constant 0 : i32
    return %c0_i32, %c0_i32_0 : i32, i32
  }
}

</mosaic_0001>

<bundles_post_ra>
// kernel: parallel_mpnn_forward.1
= control target key start
LH: loop header
LB: loop body
LE: loop exit
PB: predicated region body
PF: predicated region fallthrough
CT: control target
= control target key end

     0   :  { %s4497_s0 = inlined_call_operand.vmem [shape: bf16[16,32], index: 0, kind: input, shape index: {}]   ;;  %s4498_s1 = inlined_call_operand.vmem [shape: bf16[128,32], index: 1, kind: input, shape index: {}]   ;;  %s4499_s2 = inlined_call_operand.vmem [shape: bf16[2,32], index: 2, kind: input, shape index: {}]   ;;  %s4500_s3 = inlined_call_operand.vmem [shape: f32[2,8,8], index: 3, kind: input, shape index: {}]   ;;  %s4501_s4 = inlined_call_operand.vmem [shape: bf16[2,64,192], index: 4, kind: input, shape index: {}]   ;;  %s4502_s5 = inlined_call_operand.vmem [shape: f32[2,1,64], index: 5, kind: input, shape index: {}]   ;;  %s4503_s6 = inlined_call_operand.vmem [shape: f32[2,1,64], index: 6, kind: input, shape index: {}]   ;;  %s4504_s7 = inlined_call_operand.vmem [shape: bf16[2,32,64], index: 7, kind: input, shape index: {}]   ;;  %s4505_s8 = inlined_call_operand.vmem [shape: bf16[2,32,64], index: 8, kind: input, shape index: {}]   ;;  %s4506_s9 = inlined_call_operand.vmem [shape: bf16[2,64,64], index: 9, kind: input, shape index: {}]   ;;  %s4507_s10 = inlined_call_operand.vmem [shape: f32[2,1,64], index: 10, kind: input, shape index: {}]   ;;  %s4508_s11 = inlined_call_operand.vmem [shape: bf16[2,64,64], index: 11, kind: input, shape index: {}]   ;;  %s4509_s12 = inlined_call_operand.vmem [shape: f32[2,1,64], index: 12, kind: input, shape index: {}]   ;;  %s4510_s13 = inlined_call_operand.vmem [shape: bf16[2,64,64], index: 13, kind: input, shape index: {}]   ;;  %s4511_s14 = inlined_call_operand.vmem [shape: f32[2,1,64], index: 14, kind: input, shape index: {}]   ;;  %s4512_s15 = inlined_call_operand.vmem [shape: f32[2,1,64], index: 15, kind: input, shape index: {}]   ;;  %s4513_s16 = inlined_call_operand.vmem [shape: f32[2,1,64], index: 16, kind: input, shape index: {}]   ;;  %s4514_s17 = inlined_call_operand.vmem [shape: bf16[2,64,32], index: 17, kind: input, shape index: {}]   ;;  %s4515_s18 = inlined_call_operand.vmem [shape: f32[2,1,32], index: 18, kind: input, shape index: {}]   ;;  %s4516_s19 = inlined_call_operand.vmem [shape: bf16[32,32], index: 19, kind: input, shape index: {}]   ;;  %s4517_s20 = inlined_call_operand.vmem [shape: f32[1,32], index: 20, kind: input, shape index: {}]   ;;  %s4518_s21 = inlined_call_operand.vmem [shape: bf16[32,16], index: 21, kind: input, shape index: {}]   ;;  %s4519_s22 = inlined_call_operand.vmem [shape: f32[1,16], index: 22, kind: input, shape index: {}]   ;;  %s4520_s23 = inlined_call_operand.hbm [shape: f32[2,16], index: 23, kind: output, shape index: {}]  }
   0x1   :  { %4533 = sst [smem:[#allocation6_spill]] %s4497_s0 }
   0x2   :  { %4534 = sst [smem:[#allocation7_spill]] %s4498_s1 }
   0x3   :  { %4535 = sst [smem:[#allocation8_spill]] %s4499_s2 }
   0x4   :  { %4536 = sst [smem:[#allocation9_spill]] %s4500_s3 }
   0x5   :  { %4537 = sst [smem:[#allocation10_spill]] %s4501_s4 }
   0x6   :  { %4538 = sst [smem:[#allocation11_spill]] %s4502_s5 }
   0x7   :  { %4539 = sst [smem:[#allocation12_spill]] %s4503_s6 }
   0x8   :  { %4540 = sst [smem:[#allocation13_spill]] %s4504_s7 }
   0x9   :  { %4541 = sst [smem:[#allocation14_spill]] %s4520_s23 }
   0xa   :  { %s4542_s24 = sld [smem:[#allocation10_spill]]  ;;  %v3653_v3 = vmov 0   ;;  %vm97_vm0 = vcmask 257024   ;;  %vm100_vm1 = vcmask 519424   ;;  %vm270_vm2 = vcmask 523264   ;;  %v3541_v11 = vld [vmem:[%s4505_s8 + $0x8] sm:$0xff]  }
   0xb   :  { %306 = vmatprep.mubr.bf16.mxu0 %v3653_v3  ;;  %s4543_s3 = sld [smem:[#allocation6_spill]]  ;;  %vm382_vm3 = vcmask 261120   ;;  %v3654_v13 = vmov 0.0   ;;  %v3542_v14 = vld [vmem:[%s4505_s8] sm:$0xff]   ;;  %vm3655_vm4 = vmmov 0  }
   0xc   :  { %s4544_s0 = sld [smem:[#allocation8_spill]] }
  0x10   :  { %v3528_v0 = vld [vmem:[%s4542_s24 + $0x34] ss:$8 sps:$4 sm:$0xff]   ;;  %v3530_v1 = vld [vmem:[%s4542_s24 + $0x30] ss:$8 sps:$4 sm:$0xff]   ;;  %v3531_v2 = vld [vmem:[%s4542_s24 + $0x24] ss:$8 sps:$4 sm:$0xff]  }
  0x11   :  { %282 = vmatprep.subr.bf16.mxu0 %v3528_v0  ;;  %v3533_v4 = vld [vmem:[%s4542_s24 + $0x20] ss:$8 sps:$4 sm:$0xff]   ;;  %v3534_v5 = vld [vmem:[%s4542_s24 + $0x14] ss:$8 sps:$4 sm:$0xff]   ;;  %v77_v7 = vld [vmem:[%s4543_s3 + $0x4] sm:$0xf] }
  0x12   :  { %283 = vmatpush1.bf16.msra.mxu0 %v3530_v1  ;;  %v76_v6 = vld [vmem:[%s4543_s3] sm:$0xf]  ;;  %99 = vst.msk [vmem:[#allocation2 + $0x4] sm:$0xf] %vm97_vm0, %v77_v7  ;;  %v3536_v8 = vld [vmem:[%s4542_s24 + $0x10] ss:$8 sps:$4 sm:$0xff]  }
  0x13   :  { %284 = vmatprep.subr.bf16.mxu0 %v3531_v2  ;;  %98 = vst.msk [vmem:[#allocation2] sm:$0xf] %vm97_vm0, %v76_v6  ;;  %v3537_v9 = vld [vmem:[%s4542_s24 + $0x4] ss:$8 sps:$4 sm:$0xff]   ;;  %v3539_v10 = vld [vmem:[%s4542_s24] ss:$8 sps:$4 sm:$0xff]  }
  0x14   :  { %101 = vst.msk [vmem:[#allocation2] sm:$0xf] %vm100_vm1, %v3653_v3  ;;  %102 = vst.msk [vmem:[#allocation2 + $0x4] sm:$0xf] %vm100_vm1, %v3653_v3  ;;  %v94_v15 = vld [vmem:[%s4544_s0] sm:$0x1] }
  0x16   :  { %285 = vmatpush1.bf16.msra.mxu0 %v3533_v4 }
  0x17   :  { %286 = vmatprep.subr.bf16.mxu0 %v3534_v5 }
  0x1a   :  { %287 = vmatpush1.bf16.msra.mxu0 %v3536_v8 }
  0x1b   :  { %288 = vmatprep.subr.bf16.mxu0 %v3537_v9  ;;  %v3540_v12 = vld [vmem:[#allocation2] sm:$0xff]  }
  0x1e   :  { %289 = vmatpush1.bf16.msra.mxu0 %v3539_v10 }
  0x1f   :  { %3324 = vmatprep.subr.bf16.mxu0 %v3654_v13 }
  0x21   :  { %3003 = vmatmul.mubr.msk.bf16.vlgmr.msra.gmra.mxu0 %vm270_vm2, %v3540_v12 }
  0x22   :  { %3325 = vmatpush3.bf16.msra.mxu0 %v3541_v11  ;;  %3328 = vmatprep.mubr.msk.bf16.mxu0 %vm3655_vm4, %v3654_v13 }
  0x23   :  { %3326 = vmatprep.subr.bf16.mxu0 %v3654_v13 }
  0x26   :  { %3327 = vmatpush3.bf16.msra.mxu0 %v3542_v14 }
  0x29   :  { %3329 = vmatmul.mubr.msk.bf16.vlgmr.msra.gmra.mxu0 %vm382_vm3, %v94_v15 }
  0x2a   :  { %28 = vsyncpa [#allocation4], 0  ;;  %s4545_s25 = sld [smem:[#allocation13_spill]]  ;;  %v103_v26 = vlaneseq  ;;  %v3656_v27 = vmov 1966171168   ;;  %s4531_s30 = smov 64  }
  0x2b   :  { %s4546_s6 = sld [smem:[#allocation7_spill]]  ;;  %v572_v28 = vunpack.c.l.s4 %v3656_v27  ;;  %v3553_v49 = vld [vmem:[%s4506_s9 + $0x18] sm:$0xff]   ;;  %v3554_v51 = vld [vmem:[%s4506_s9 + $0x10] sm:$0xff]   ;;  %v3555_v55 = vld [vmem:[%s4506_s9 + $0x8] sm:$0xff]   ;;  %s4529_s26 = smov 96   ;;  %vm2852_vm5 = vcmask 1041409  }
  0x2c   :  { %v3873_v31 = vshrl.u32 %v103_v26, 7  ;;  %s4547_s4 = sld [smem:[#allocation11_spill]]  ;;  %3332 = vmatprep.subr.bf16.mxu0 %v3553_v49  ;;  %v3556_v63 = vld [vmem:[%s4506_s9] sm:$0xff]   ;;  %s3659_s28 = smov 32   ;;  %vm2978_vm6 = vcmask 123904  }
  0x2d   :  { %v573_v32 = vunpack.c.0.s8 %v572_v28  ;;  %3333 = vmatpush3.bf16.msra.mxu0 %v3553_v49  ;;  %s4548_s5 = sld [smem:[#allocation9_spill]]  ;;  %s3660_s23 = smov [#allocation3]  }
  0x2e   :  { %v3887_v41 = vsub.s32 0, %v3873_v31  ;;  %3334 = vmatprep.subr.bf16.mxu0 %v3554_v51  ;;  %s4549_s3 = sld [smem:[#allocation12_spill]] }
  0x2f   :  { %v3883_v36 = vsub.s32 %v573_v32, %v3873_v31 }
  0x30   :  { %v3543_v16 = vld [vmem:[%s4545_s25 + $0x8] sm:$0xff]   ;;  %v3544_v17 = vld [vmem:[%s4545_s25] sm:$0xff]  }
  0x31   :  { %v3545_v18 = vld [vmem:[%s4546_s6] sm:$0xff]   ;;  %3304 = vmatprep.subr.bf16.mxu1 %v3543_v16  ;;  %v3546_v19 = vld [vmem:[%s4546_s6 + $0x8] sm:$0xff]   ;;  %v3547_v20 = vld [vmem:[%s4546_s6 + $0x10] sm:$0xff]   ;;  %3335 = vmatpush3.bf16.msra.mxu0 %v3554_v51 }
  0x32   :  { %3308 = vmatprep.mubr.msk.bf16.mxu1 %vm382_vm3, %v3545_v18  ;;  %3305 = vmatpush3.bf16.msra.mxu1 %v3543_v16  ;;  %v3548_v21 = vld [vmem:[%s4546_s6 + $0x18] sm:$0xff]   ;;  %v3549_v22 = vld [vmem:[%s4546_s6 + $0x20] sm:$0xff]   ;;  %v3550_v23 = vld [vmem:[%s4546_s6 + $0x28] sm:$0xff]  }
  0x33   :  { %3306 = vmatprep.subr.bf16.mxu1 %v3544_v17  ;;  %v3551_v24 = vld [vmem:[%s4546_s6 + $0x30] sm:$0xff]   ;;  %v3552_v25 = vld [vmem:[%s4546_s6 + $0x38] sm:$0xff]   ;;  %v3023_v35 = vld [vmem:[%s4547_s4] ss:$0 sm:$0xff]  ;;  %3336 = vmatprep.subr.bf16.mxu0 %v3555_v55 }
  0x35   :  { %3337 = vmatpush3.bf16.msra.mxu0 %v3555_v55 }
  0x36   :  { %3307 = vmatpush3.bf16.msra.mxu1 %v3544_v17  ;;  %3338 = vmatprep.subr.bf16.mxu0 %v3556_v63 }
  0x39   :  { %3309 = vmatmul.mubr.msk.bf16.vlgmr.msra.gmra.mxu1 %vm382_vm3, %v3546_v19  ;;  %3339 = vmatpush3.bf16.msra.mxu0 %v3556_v63 }
  0x3a   :  { %3312 = vmatprep.mubr.msk.bf16.mxu1 %vm382_vm3, %v3547_v20  ;;  %3380 = vmatprep.subr.bf16.mxu0 %v3654_v13 }
  0x41   :  { %3313 = vmatmul.mubr.msk.bf16.gmra.mxu1 %vm382_vm3, %v3548_v21 }
  0x42   :  { %3316 = vmatprep.mubr.msk.bf16.mxu1 %vm382_vm3, %v3549_v22 }
  0x49   :  { %3317 = vmatmul.mubr.msk.bf16.gmra.mxu1 %vm382_vm3, %v3550_v23 }
  0x4a   :  { %3320 = vmatprep.mubr.msk.bf16.mxu1 %vm382_vm3, %v3551_v24 }
  0x51   :  { %3321 = vmatmul.mubr.msk.bf16.gmra.mxu1 %vm382_vm3, %v3552_v25 }
  0xe1   :  { %v3869_v29 = vpop.f32.mrf.mxu0 }
  0xe3   :  { %v3871_v30 = vpop.f32.mrf.mxu0 }
  0xe5   :  { %v3875_v33 = vpop.f32.mrf.mxu0 }
  0xe7   :  { %v3877_v34 = vpop.f32.mrf.mxu0 }
  0xe9   :  { %v564_v37 = vpop.f32.mrf.mxu0 }
  0xea   :  { %v565_v38 = vadd.f32 %v3023_v35, %v564_v37 }
  0xeb   :  { %v3330_v39 = vpop.f32.mrf.mxu0 }
  0xec   :  { %v577_v40 = vrot.slane %v565_v38, %v3883_v36 }
  0xed   :  { %v567_v42 = vpop.f32.mrf.mxu0 }
  0xee   :  { %v578_v43 = vcombine.high %v577_v40, %v577_v40  ;;  %v585_v44 = vrot.slane %v577_v40, %v3883_v36 }
  0xef   :  { %v3331_v45 = vpop.f32.mrf.mxu0 }
  0xf0   :  { %v596_v46 = vrot.slane %v585_v44, %v3887_v41  ;;  %v592_v47 = vrot.slane %v578_v43, %v3883_v36  ;;  %v3557_v43 = vld [vmem:[%s4508_s11 + $0x18] sm:$0xff]   ;;  %v3558_v44 = vld [vmem:[%s4508_s11 + $0x10] sm:$0xff]  }
  0xf1   :  { %3356 = vmatprep.subr.bf16.mxu1 %v3557_v43 }
  0xf2   :  { %601 = vrot.lane.b32.xlu0 %v596_v46, %s4531_s30  ;;  %v600_v48 = vrot.slane %v592_v47, %v3887_v41  ;;  %3357 = vmatpush3.bf16.msra.mxu1 %v3557_v43  ;;  %v3559_v46 = vld [vmem:[%s4508_s11 + $0x8] sm:$0xff]  }
  0xf3   :  { %3358 = vmatprep.subr.bf16.mxu1 %v3558_v44 }
  0xf6   :  { %603 = vrot.lane.b32.xlu0 %v600_v48, %s4531_s30  ;;  %3359 = vmatpush3.bf16.msra.mxu1 %v3558_v44 }
  0xf7   :  { %3360 = vmatprep.subr.bf16.mxu1 %v3559_v46 }
  0xf9   :  { %v3310_v47 = vpop.f32.mrf.mxu1 }
  0xfa   :  { %3361 = vmatpush3.bf16.msra.mxu1 %v3559_v46 }
  0xfb   :  { %v441_v48 = vpop.f32.mrf.mxu1 }
  0xfd   :  { %v3311_v49 = vpop.f32.mrf.mxu1 }
 0x164   :  { %v602_v50 = vpop.permute.xlu0 %601 }
 0x165   :  { %v607_v52 = vadd.f32 %v602_v50, %v3869_v29  ;;  %v444_v50 = vpop.f32.mrf.mxu1 }
 0x167   :  { %v611_v53 = vcombine.high %v607_v52, %v607_v52  ;;  %v618_v54 = vrot.slane %v607_v52, %v3883_v36  ;;  %v3314_v51 = vpop.f32.mrf.mxu1 }
 0x168   :  { %v604_v59 = vpop.permute.xlu0 %603 }
 0x169   :  { %v626_v56 = vcombine.high %v618_v54, %v618_v54  ;;  %v634_v57 = vrot.slane %v618_v54, %v3883_v36  ;;  %v625_v58 = vrot.slane %v611_v53, %v3883_v36  ;;  %v608_v0 = vadd.f32 %v604_v59, %v3875_v33  ;;  %v457_v52 = vpop.f32.mrf.mxu1 }
 0x16b   :  { %v712_v60 = vrot.slane %v634_v57, %v3887_v41  ;;  %v656_v61 = vcombine.high %v634_v57, %v634_v57  ;;  %v648_v62 = vrot.slane %v626_v56, %v3883_v36  ;;  %v641_v2 = vrot.slane %v625_v58, %v3883_v36  ;;  %v3315_v53 = vpop.f32.mrf.mxu1 }
 0x16c   :  { %v627_v4 = vcombine.high %v625_v58, %v625_v58  ;;  %v667_v7 = vrot.slane %v608_v0, %v3883_v36  ;;  %v660_v12 = vcombine.high %v608_v0, %v608_v0 }
 0x16d   :  { %773 = vrot.lane.b32.xlu1 %v712_v60, %s4531_s30  ;;  %v720_v1 = vrot.slane %v656_v61, %v3887_v41  ;;  %v716_v5 = vrot.slane %v648_v62, %v3887_v41  ;;  %v658_v6 = vcombine.high %v648_v62, %v648_v62  ;;  %v728_v8 = vrot.slane %v641_v2, %v3887_v41  ;;  %v460_v54 = vpop.f32.mrf.mxu1 }
 0x16e   :  { %v657_v9 = vcombine.high %v641_v2, %v641_v2  ;;  %v655_v11 = vrot.slane %v627_v4, %v3883_v36  ;;  %v683_v14 = vrot.slane %v667_v7, %v3883_v36  ;;  %v675_v16 = vcombine.high %v667_v7, %v667_v7 }
 0x16f   :  { %777 = vrot.lane.b32.xlu0 %v720_v1, %s4531_s30  ;;  %v724_v10 = vrot.slane %v658_v6, %v3887_v41  ;;  %v674_v19 = vrot.slane %v660_v12, %v3883_v36  ;;  %v3318_v57 = vpop.f32.mrf.mxu1 }
 0x170   :  { %v736_v15 = vrot.slane %v657_v9, %v3887_v41  ;;  %v732_v17 = vrot.slane %v655_v11, %v3887_v41  ;;  %v659_v18 = vcombine.high %v655_v11, %v655_v11  ;;  %v744_v20 = vrot.slane %v683_v14, %v3887_v41 }
 0x171   :  { %775 = vrot.lane.b32.xlu1 %v716_v5, %s4531_s30  ;;  %v705_v21 = vcombine.high %v683_v14, %v683_v14  ;;  %v697_v23 = vrot.slane %v675_v16, %v3883_v36  ;;  %v690_v25 = vrot.slane %v674_v19, %v3883_v36  ;;  %v676_v26 = vcombine.high %v674_v19, %v674_v19  ;;  %v473_v63 = vpop.f32.mrf.mxu1 }
 0x172   :  { %v740_v22 = vrot.slane %v659_v18, %v3887_v41 }
 0x173   :  { %781 = vrot.lane.b32.xlu0 %v728_v8, %s4531_s30  ;;  %v752_v24 = vrot.slane %v705_v21, %v3887_v41  ;;  %v748_v27 = vrot.slane %v697_v23, %v3887_v41  ;;  %v707_v28 = vcombine.high %v697_v23, %v697_v23  ;;  %v760_v32 = vrot.slane %v690_v25, %v3887_v41  ;;  %v3319_v9 = vpop.f32.mrf.mxu1 }
 0x174   :  { %v706_v35 = vcombine.high %v690_v25, %v690_v25  ;;  %v704_v38 = vrot.slane %v676_v26, %v3883_v36 }
 0x175   :  { %779 = vrot.lane.b32.xlu1 %v724_v10, %s4531_s30  ;;  %v756_v37 = vrot.slane %v707_v28, %v3887_v41 }
 0x176   :  { %v768_v39 = vrot.slane %v706_v35, %v3887_v41  ;;  %v764_v40 = vrot.slane %v704_v38, %v3887_v41  ;;  %v708_v42 = vcombine.high %v704_v38, %v704_v38 }
 0x177   :  { %785 = vrot.lane.b32.xlu0 %v736_v15, %s4531_s30 }
 0x178   :  { %v772_v45 = vrot.slane %v708_v42, %v3887_v41 }
 0x179   :  { %783 = vrot.lane.b32.xlu1 %v732_v17, %s4531_s30 }
 0x17b   :  { %789 = vrot.lane.b32.xlu0 %v744_v20, %s4531_s30  ;;  %v476_v20 = vpop.f32.mrf.mxu1 }
 0x17d   :  { %787 = vrot.lane.b32.xlu1 %v740_v22, %s4531_s30  ;;  %v3322_v35 = vpop.f32.mrf.mxu1 }
 0x17f   :  { %793 = vrot.lane.b32.xlu0 %v752_v24, %s4531_s30 }
 0x181   :  { %791 = vrot.lane.b32.xlu1 %v748_v27, %s4531_s30 }
 0x183   :  { %797 = vrot.lane.b32.xlu0 %v760_v32, %s4531_s30 }
 0x185   :  { %795 = vrot.lane.b32.xlu1 %v756_v37, %s4531_s30 }
 0x187   :  { %801 = vrot.lane.b32.xlu0 %v768_v39, %s4531_s30 }
 0x189   :  { %799 = vrot.lane.b32.xlu1 %v764_v40, %s4531_s30 }
 0x18d   :  { %803 = vrot.lane.b32.xlu1 %v772_v45, %s4531_s30  ;;  %s2986_s30 = sshll.u32 %s3660_s23, 4  ;;  %s2987_s30 = int_to_ptr.vmem [resolvable:$true] %s2986_s30 }
 0x18e   :  { %p3636_p1 = scmp.lt.s32.totalorder %s2987_s30, %s2987_s30 }
 0x1df   :  { %v774_v55 = vpop.permute.xlu1 %773 }
 0x1e0   :  { %v821_v56 = vadd.f32 %v774_v55, %v3869_v29 }
 0x1e1   :  { %v778_v58 = vpop.permute.xlu0 %777 }
 0x1e2   :  { %v837_v60 = vadd.f32 %v821_v56, %v441_v48  ;;  %v823_v61 = vadd.f32 %v778_v58, %v3869_v29 }
 0x1e3   :  { %v776_v59 = vpop.permute.xlu1 %775 }
 0x1e4   :  { %v822_v62 = vadd.f32 %v776_v59, %v3869_v29  ;;  %v853_v5 = vmax.f32 %v837_v60, 0.0  ;;  %v839_v6 = vadd.f32 %v3310_v47, %v823_v61  ;;  %v489_v47 = vpop.f32.mrf.mxu1 }
 0x1e5   :  { %v782_v1 = vpop.permute.xlu0 %781 }
 0x1e6   :  { %v838_v0 = vadd.f32 %v822_v62, %v444_v50  ;;  %v825_v2 = vadd.f32 %v782_v1, %v3869_v29  ;;  %v855_v16 = vmax.f32 %v839_v6, 0.0  ;;  %v3323_v56 = vpop.f32.mrf.mxu1 }
 0x1e7   :  { %v780_v4 = vpop.permute.xlu1 %779 }
 0x1e8   :  { %v854_v7 = vmax.f32 %v838_v0, 0.0  ;;  %v824_v8 = vadd.f32 %v780_v4, %v3869_v29  ;;  %v841_v14 = vadd.f32 %v825_v2, %v457_v52  ;;  %v492_v2 = vpop.f32.mrf.mxu1 }
 0x1e9   :  { %v786_v12 = vpop.permute.xlu0 %785 }
 0x1ea   :  { %v869_v10 = vpack.c.bf16 %v854_v7, %v853_v5  ;;  %v840_v11 = vadd.f32 %v3311_v49, %v824_v8  ;;  %v827_v18 = vadd.f32 %v786_v12, %v3869_v29  ;;  %v857_v24 = vmax.f32 %v841_v14, 0.0 }
 0x1eb   :  { %v784_v15 = vpop.permute.xlu1 %783 }
 0x1ec   :  { %v856_v17 = vmax.f32 %v840_v11, 0.0  ;;  %v826_v19 = vadd.f32 %v784_v15, %v3869_v29  ;;  %3340 = vmatprep.mubr.msk.bf16.mxu0 %vm270_vm2, %v869_v10  ;;  %v843_v26 = vadd.f32 %v3314_v51, %v827_v18  ;;  %v119_v18 = vsub.s32 2, %v3873_v31 }
 0x1ed   :  { %v790_v23 = vpop.permute.xlu0 %789 }
 0x1ee   :  { %v870_v21 = vpack.c.bf16 %v856_v17, %v855_v16  ;;  %v842_v22 = vadd.f32 %v826_v19, %v460_v54  ;;  %v829_v28 = vadd.f32 %v790_v23, %v3875_v33  ;;  %v859_v43 = vmax.f32 %v843_v26, 0.0  ;;  %v3560_v17 = vld [vmem:[%s4508_s11] sm:$0xff]  }
 0x1ef   :  { %v788_v25 = vpop.permute.xlu1 %787  ;;  %3362 = vmatprep.subr.bf16.mxu1 %v3560_v17  ;;  %v112_v19 = vsub.s32 1, %v3873_v31 }
 0x1f0   :  { %v858_v27 = vmax.f32 %v842_v22, 0.0  ;;  %v828_v32 = vadd.f32 %v788_v25, %v3869_v29  ;;  %3341 = vmatmul.mubr.msk.bf16.vlgmr.msra.gmra.mxu0 %vm270_vm2, %v870_v21  ;;  %v845_v44 = vadd.f32 %v829_v28, %v473_v63  ;;  %3363 = vmatpush3.bf16.msra.mxu1 %v3560_v17 }
 0x1f1   :  { %v794_v39 = vpop.permute.xlu0 %793  ;;  %3392 = vmatprep.subr.bf16.mxu1 %v3654_v13 }
 0x1f2   :  { %v871_v37 = vpack.c.bf16 %v858_v27, %v857_v24  ;;  %v844_v38 = vadd.f32 %v3315_v53, %v828_v32  ;;  %v831_v40 = vadd.f32 %v794_v39, %v3875_v33  ;;  %v861_v52 = vmax.f32 %v845_v44, 0.0  ;;  %v96_v24 = vld [vmem:[%s4548_s5 + $0x8] sm:$0xff] }
 0x1f3   :  { %v792_v42 = vpop.permute.xlu1 %791  ;;  %v162_v26 = vrot.slane %v96_v24, %v3887_v41  ;;  %v169_v27 = vrot.slane %v96_v24, %v112_v19  ;;  %v176_v28 = vrot.slane %v96_v24, %v119_v18  ;;  %v133_v32 = vsub.s32 4, %v3873_v31 }
 0x1f4   :  { %v860_v45 = vmax.f32 %v844_v38, 0.0  ;;  %v830_v46 = vadd.f32 %v792_v42, %v3875_v33  ;;  %3344 = vmatprep.mubr.msk.bf16.mxu0 %vm270_vm2, %v871_v37  ;;  %v847_v50 = vadd.f32 %v3318_v57, %v831_v40  ;;  %v140_v37 = vsub.s32 5, %v3873_v31 }
 0x1f5   :  { %v798_v29 = vpop.permute.xlu0 %797  ;;  %v190_v40 = vrot.slane %v96_v24, %v133_v32  ;;  %v147_v42 = vsub.s32 6, %v3873_v31  ;;  %v154_v44 = vsub.s32 7, %v3873_v31 }
 0x1f6   :  { %v872_v48 = vpack.c.bf16 %v860_v45, %v859_v43  ;;  %v846_v49 = vadd.f32 %v830_v46, %v476_v20  ;;  %v833_v53 = vadd.f32 %v798_v29, %v3875_v33  ;;  %v863_v61 = vmax.f32 %v847_v50, 0.0  ;;  %v3027_v50 = vld [vmem:[%s4507_s10] ss:$0 sm:$0xff] }
 0x1f7   :  { %v796_v51 = vpop.permute.xlu1 %795  ;;  %v126_v20 = vsub.s32 3, %v3873_v31  ;;  %v197_v43 = vrot.slane %v96_v24, %v140_v37 }
 0x1f8   :  { %v862_v54 = vmax.f32 %v846_v49, 0.0  ;;  %v832_v55 = vadd.f32 %v796_v51, %v3875_v33  ;;  %3345 = vmatmul.mubr.msk.bf16.gmra.mxu0 %vm270_vm2, %v872_v48  ;;  %v849_v63 = vadd.f32 %v833_v53, %v489_v47  ;;  %v204_v47 = vrot.slane %v96_v24, %v147_v42 }
 0x1f9   :  { %v802_v60 = vpop.permute.xlu0 %801  ;;  %v211_v48 = vrot.slane %v96_v24, %v154_v44 }
 0x1fa   :  { %v873_v58 = vpack.c.bf16 %v862_v54, %v861_v52  ;;  %v848_v59 = vadd.f32 %v3319_v9, %v832_v55  ;;  %v835_v1 = vadd.f32 %v802_v60, %v3875_v33  ;;  %v865_v7 = vmax.f32 %v849_v63, 0.0 }
 0x1fb   :  { %v800_v62 = vpop.permute.xlu1 %799 }
 0x1fc   :  { %v864_v0 = vmax.f32 %v848_v59, 0.0  ;;  %v834_v57 = vadd.f32 %v800_v62, %v3875_v33  ;;  %3348 = vmatprep.mubr.msk.bf16.mxu0 %vm270_vm2, %v873_v58  ;;  %v851_v8 = vadd.f32 %v3322_v35, %v835_v1  ;;  %v183_v35 = vrot.slane %v96_v24, %v126_v20 }
 0x1fe   :  { %v874_v4 = vpack.c.bf16 %v864_v0, %v863_v61  ;;  %v850_v5 = vadd.f32 %v834_v57, %v492_v2  ;;  %v867_v14 = vmax.f32 %v851_v8, 0.0 }
 0x1ff   :  { %v804_v6 = vpop.permute.xlu1 %803 }
 0x200   :  { %v866_v10 = vmax.f32 %v850_v5, 0.0  ;;  %v836_v9 = vadd.f32 %v804_v6, %v3875_v33  ;;  %3349 = vmatmul.mubr.msk.bf16.gmra.mxu0 %vm270_vm2, %v874_v4  ;;  %v95_v33 = vld [vmem:[%s4548_s5] sm:$0xff] }
 0x201   :  { %v106_v21 = vrot.slane %v95_v33, %v3887_v41  ;;  %v113_v22 = vrot.slane %v95_v33, %v112_v19  ;;  %v120_v23 = vrot.slane %v95_v33, %v119_v18  ;;  %v127_v25 = vrot.slane %v95_v33, %v126_v20 }
 0x202   :  { %v875_v11 = vpack.c.bf16 %v866_v10, %v865_v7  ;;  %v852_v12 = vadd.f32 %v3323_v56, %v836_v9  ;;  %v134_v38 = vrot.slane %v95_v33, %v133_v32  ;;  %v141_v39 = vrot.slane %v95_v33, %v140_v37 }
 0x203   :  { %108 = vbcast.lane.b32.xlu0 %v106_v21, 256  ;;  %115 = vbcast.lane.b32.xlu1 %v113_v22, 256  ;;  %v148_v45 = vrot.slane %v95_v33, %v147_v42  ;;  %v155_v46 = vrot.slane %v95_v33, %v154_v44 }
 0x204   :  { %v868_v15 = vmax.f32 %v852_v12, 0.0  ;;  %3352 = vmatprep.mubr.msk.bf16.mxu0 %vm270_vm2, %v875_v11 }
 0x206   :  { %v876_v16 = vpack.c.bf16 %v868_v15, %v867_v14 }
 0x207   :  { %122 = vbcast.lane.b32.xlu0 %v120_v23, 256  ;;  %129 = vbcast.lane.b32.xlu1 %v127_v25, 256 }
 0x208   :  { %3353 = vmatmul.mubr.msk.bf16.gmra.mxu0 %vm270_vm2, %v876_v16 }
 0x209   :  { %3388 = vmatprep.mubr.msk.bf16.mxu0 %vm3655_vm4, %v3654_v13 }
 0x20b   :  { %164 = vbcast.lane.b32.xlu0 %v162_v26, 256  ;;  %171 = vbcast.lane.b32.xlu1 %v169_v27, 256 }
 0x20f   :  { %178 = vbcast.lane.b32.xlu0 %v176_v28, 256  ;;  %185 = vbcast.lane.b32.xlu1 %v183_v35, 256 }
 0x213   :  { %136 = vbcast.lane.b32.xlu0 %v134_v38, 256  ;;  %143 = vbcast.lane.b32.xlu1 %v141_v39, 256 }
 0x217   :  { %192 = vbcast.lane.b32.xlu0 %v190_v40, 256  ;;  %199 = vbcast.lane.b32.xlu1 %v197_v43, 256 }
 0x21b   :  { %150 = vbcast.lane.b32.xlu0 %v148_v45, 256  ;;  %157 = vbcast.lane.b32.xlu1 %v155_v46, 256 }
 0x21f   :  { %206 = vbcast.lane.b32.xlu0 %v204_v47, 256  ;;  %213 = vbcast.lane.b32.xlu1 %v211_v48, 256  ;;  %v3561_v48 = vld [vmem:[%s4510_s13 + $0x18] sm:$0xff]  }
 0x220   :  { %3381 = vmatpush3.bf16.msra.mxu0 %v3561_v48 }
 0x221   :  { %3382 = vmatprep.subr.bf16.mxu0 %v3654_v13 }
 0x2b0   :  { %v3342_v49 = vpop.f32.mrf.mxu0 }
 0x2b1   :  { %v983_v31 = vadd.f32 %v3342_v49, %v3027_v50  ;;  %v3562_v49 = vld [vmem:[%s4510_s13 + $0x10] sm:$0xff]  }
 0x2b2   :  { %v974_v29 = vpop.f32.mrf.mxu0  ;;  %3383 = vmatpush3.bf16.msra.mxu0 %v3562_v49 }
 0x2b3   :  { %v975_v52 = vadd.f32 %v3027_v50, %v974_v29  ;;  %v1039_v61 = vmax.f32 %v983_v31, 0.0  ;;  %3384 = vmatprep.subr.bf16.mxu0 %v3654_v13  ;;  %v3563_v29 = vld [vmem:[%s4510_s13 + $0x8] sm:$0xff]  }
 0x2b4   :  { %v3343_v51 = vpop.f32.mrf.mxu0 }
 0x2b5   :  { %v986_v54 = vadd.f32 %v3343_v51, %v3027_v50  ;;  %v1037_v59 = vmax.f32 %v975_v52, 0.0  ;;  %v4036_v51 = vpop.permute.xlu0 %108  ;;  %v4038_v52 = vpop.permute.xlu1 %115 }
 0x2b6   :  { %v977_v53 = vpop.f32.mrf.mxu0  ;;  %3385 = vmatpush3.bf16.msra.mxu0 %v3563_v29 }
 0x2b7   :  { %v978_v55 = vadd.f32 %v3027_v50, %v977_v53  ;;  %v1040_v56 = vmax.f32 %v986_v54, 0.0  ;;  %3386 = vmatprep.subr.bf16.mxu0 %v3654_v13 }
 0x2b8   :  { %v3346_v58 = vpop.f32.mrf.mxu0 }
 0x2b9   :  { %v1038_v60 = vmax.f32 %v978_v55, 0.0  ;;  %v1054_v0 = vpack.c.bf16 %v1040_v56, %v1039_v61  ;;  %v999_v4 = vadd.f32 %v3346_v58, %v3027_v50  ;;  %v4040_v54 = vpop.permute.xlu0 %122  ;;  %v4042_v31 = vpop.permute.xlu1 %129 }
 0x2ba   :  { %v990_v62 = vpop.f32.mrf.mxu0 }
 0x2bb   :  { %v1053_v63 = vpack.c.bf16 %v1038_v60, %v1037_v59  ;;  %v991_v57 = vadd.f32 %v3027_v50, %v990_v62  ;;  %v1043_v11 = vmax.f32 %v999_v4, 0.0 }
 0x2bc   :  { %v3347_v1 = vpop.f32.mrf.mxu0 }
 0x2bd   :  { %v1002_v2 = vadd.f32 %v3347_v1, %v3027_v50  ;;  %3364 = vmatprep.mubr.msk.bf16.mxu1 %vm270_vm2, %v1053_v63  ;;  %v1041_v10 = vmax.f32 %v991_v57, 0.0  ;;  %v4044_v55 = vpop.permute.xlu0 %164  ;;  %v4046_v56 = vpop.permute.xlu1 %171 }
 0x2be   :  { %v993_v5 = vpop.f32.mrf.mxu0  ;;  %3365 = vmatmul.mubr.msk.bf16.vlgmr.msra.gmra.mxu1 %vm270_vm2, %v1054_v0 }
 0x2bf   :  { %v994_v6 = vadd.f32 %v3027_v50, %v993_v5  ;;  %v1044_v7 = vmax.f32 %v1002_v2, 0.0 }
 0x2c0   :  { %v3350_v8 = vpop.f32.mrf.mxu0 }
 0x2c1   :  { %v1042_v9 = vmax.f32 %v994_v6, 0.0  ;;  %v1056_v15 = vpack.c.bf16 %v1044_v7, %v1043_v11  ;;  %v1015_v18 = vadd.f32 %v3350_v8, %v3027_v50  ;;  %v4048_v61 = vpop.permute.xlu0 %178  ;;  %v4050_v62 = vpop.permute.xlu1 %185  ;;  %v3040_v6 = vld [vmem:[%s4509_s12] ss:$0 sm:$0xff] }
 0x2c2   :  { %v1006_v12 = vpop.f32.mrf.mxu0 }
 0x2c3   :  { %v1055_v14 = vpack.c.bf16 %v1042_v9, %v1041_v10  ;;  %v1007_v17 = vadd.f32 %v3027_v50, %v1006_v12  ;;  %v1047_v25 = vmax.f32 %v1015_v18, 0.0 }
 0x2c4   :  { %v3351_v16 = vpop.f32.mrf.mxu0 }
 0x2c5   :  { %v1018_v33 = vadd.f32 %v3351_v16, %v3027_v50  ;;  %3368 = vmatprep.mubr.msk.bf16.mxu1 %vm270_vm2, %v1055_v14  ;;  %v1045_v23 = vmax.f32 %v1007_v17, 0.0  ;;  %v4052_v57 = vpop.permute.xlu0 %136  ;;  %v4054_v2 = vpop.permute.xlu1 %143 }
 0x2c6   :  { %v1009_v19 = vpop.f32.mrf.mxu0  ;;  %3369 = vmatmul.mubr.msk.bf16.gmra.mxu1 %vm270_vm2, %v1056_v15 }
 0x2c7   :  { %v1010_v20 = vadd.f32 %v3027_v50, %v1009_v19  ;;  %v1048_v21 = vmax.f32 %v1018_v33, 0.0 }
 0x2c8   :  { %v3354_v22 = vpop.f32.mrf.mxu0 }
 0x2c9   :  { %v1046_v24 = vmax.f32 %v1010_v20, 0.0  ;;  %v1058_v28 = vpack.c.bf16 %v1048_v21, %v1047_v25  ;;  %v1031_v38 = vadd.f32 %v3354_v22, %v3027_v50  ;;  %v4059_v10 = vpop.permute.xlu0 %192  ;;  %v4061_v12 = vpop.permute.xlu1 %199 }
 0x2ca   :  { %v1022_v26 = vpop.f32.mrf.mxu0 }
 0x2cb   :  { %v1057_v27 = vpack.c.bf16 %v1046_v24, %v1045_v23  ;;  %v1023_v35 = vadd.f32 %v3027_v50, %v1022_v26  ;;  %v1051_v45 = vmax.f32 %v1031_v38, 0.0 }
 0x2cc   :  { %v3355_v32 = vpop.f32.mrf.mxu0 }
 0x2cd   :  { %v1034_v37 = vadd.f32 %v3355_v32, %v3027_v50  ;;  %3372 = vmatprep.mubr.msk.bf16.mxu1 %vm270_vm2, %v1057_v27  ;;  %v1049_v43 = vmax.f32 %v1023_v35, 0.0  ;;  %v4068_v27 = vpop.permute.xlu0 %150 }
 0x2ce   :  { %v1025_v39 = vpop.f32.mrf.mxu0  ;;  %3373 = vmatmul.mubr.msk.bf16.gmra.mxu1 %vm270_vm2, %v1058_v28 }
 0x2cf   :  { %v1026_v40 = vadd.f32 %v3027_v50, %v1025_v39  ;;  %v1052_v42 = vmax.f32 %v1034_v37, 0.0  ;;  %v3564_v50 = vld [vmem:[%s4510_s13] sm:$0xff]   ;;  %v4073_v39 = vpop.permute.xlu1 %157 }
 0x2d0   :  { %3387 = vmatpush3.bf16.msra.mxu0 %v3564_v50 }
 0x2d1   :  { %v1050_v44 = vmax.f32 %v1026_v40, 0.0  ;;  %v1060_v47 = vpack.c.bf16 %v1052_v42, %v1051_v45 }
 0x2d3   :  { %v1059_v46 = vpack.c.bf16 %v1050_v44, %v1049_v43 }
 0x2d5   :  { %3376 = vmatprep.mubr.msk.bf16.mxu1 %vm270_vm2, %v1059_v46 }
 0x2d6   :  { %3377 = vmatmul.mubr.msk.bf16.gmra.mxu1 %vm270_vm2, %v1060_v47 }
 0x2d7   :  { %3400 = vmatprep.mubr.msk.bf16.mxu1 %vm3655_vm4, %v3654_v13 }
 0x37e   :  { %v3366_v53 = vpop.f32.mrf.mxu1 }
 0x37f   :  { %v1167_v17 = vadd.f32 %v3366_v53, %v3040_v6 }
 0x380   :  { %v1158_v58 = vpop.f32.mrf.mxu1 }
 0x381   :  { %v1159_v7 = vadd.f32 %v3040_v6, %v1158_v58  ;;  %v1223_v32 = vadd.f32 %v1167_v17, %v4040_v54  ;;  %v4082_v58 = vpop.permute.xlu0 %206 }
 0x382   :  { %v3367_v59 = vpop.f32.mrf.mxu1 }
 0x383   :  { %v1170_v11 = vadd.f32 %v3367_v59, %v3040_v6  ;;  %v1221_v33 = vadd.f32 %v1159_v7, %v4036_v51 }
 0x384   :  { %v1161_v60 = vpop.f32.mrf.mxu1 }
 0x385   :  { %v1162_v9 = vadd.f32 %v3040_v6, %v1161_v60  ;;  %v1224_v23 = vadd.f32 %v1170_v11, %v4042_v31  ;;  %v1237_v35 = vsel %vm270_vm2, %v1221_v33, -inf }
 0x386   :  { %v3370_v63 = vpop.f32.mrf.mxu1 }
 0x387   :  { %v1222_v20 = vadd.f32 %v1162_v9, %v4038_v52  ;;  %v1241_v46 = vsel %vm270_vm2, %v1224_v23, -inf  ;;  %v1183_v47 = vadd.f32 %v3370_v63, %v3040_v6 }
 0x388   :  { %v1174_v0 = vpop.f32.mrf.mxu1 }
 0x389   :  { %v1175_v18 = vadd.f32 %v3040_v6, %v1174_v0  ;;  %v1238_v42 = vsel %vm270_vm2, %v1222_v20, -inf  ;;  %v1239_v0 = vsel %vm270_vm2, %v1223_v32, -inf }
 0x38a   :  { %v3371_v1 = vpop.f32.mrf.mxu1 }
 0x38b   :  { %v1225_v37 = vadd.f32 %v1175_v18, %v4052_v57  ;;  %v1186_v38 = vadd.f32 %v3371_v1, %v3040_v6  ;;  %v1242_v1 = vmax.f32 %v1238_v42, %v1241_v46  ;;  %v3004_v46 = vld [vmem:[%s4549_s3] ss:$0 sm:$0xff] }
 0x38c   :  { %v1177_v4 = vpop.f32.mrf.mxu1 }
 0x38d   :  { %v1178_v14 = vadd.f32 %v3040_v6, %v1177_v4  ;;  %v1243_v4 = vsel %vm270_vm2, %v1225_v37, -inf  ;;  %v1228_v63 = vadd.f32 %v1186_v38, %v4073_v39 }
 0x38e   :  { %v3374_v5 = vpop.f32.mrf.mxu1 }
 0x38f   :  { %v1199_v21 = vadd.f32 %v3374_v5, %v3040_v6  ;;  %v1226_v24 = vadd.f32 %v1178_v14, %v4054_v2  ;;  %v4088_v5 = vpop.permute.xlu1 %213 }
 0x390   :  { %v1190_v8 = vpop.f32.mrf.mxu1 }
 0x391   :  { %v1191_v15 = vadd.f32 %v3040_v6, %v1190_v8  ;;  %v1231_v43 = vadd.f32 %v1199_v21, %v4048_v61  ;;  %v1245_v48 = vsel %vm270_vm2, %v1226_v24, -inf }
 0x392   :  { %v3375_v16 = vpop.f32.mrf.mxu1  ;;  %v1246_v17 = vmax.f32 %v1242_v1, %v1245_v48 }
 0x393   :  { %v1229_v25 = vadd.f32 %v1191_v15, %v4044_v55  ;;  %v1202_v28 = vadd.f32 %v3375_v16, %v3040_v6  ;;  %v1254_v8 = vsel %vm270_vm2, %v1231_v43, -inf  ;;  %v1240_v15 = vmax.f32 %v1237_v35, %v1239_v0 }
 0x394   :  { %v1193_v19 = vpop.f32.mrf.mxu1  ;;  %v1227_v16 = vadd.f32 %v1183_v47, %v4068_v27  ;;  %v3053_v47 = vld [vmem:[%s4511_s14] ss:$0 sm:$0xff] }
 0x395   :  { %v1194_v22 = vadd.f32 %v3040_v6, %v1193_v19  ;;  %v1252_v49 = vsel %vm270_vm2, %v1229_v25, -inf  ;;  %v1232_v50 = vadd.f32 %v1202_v28, %v4050_v62  ;;  %v1249_v25 = vsel %vm270_vm2, %v1228_v63, -inf }
 0x396   :  { %v3378_v26 = vpop.f32.mrf.mxu1  ;;  %v1255_v33 = vmax.f32 %v1252_v49, %v1254_v8  ;;  %v1247_v32 = vsel %vm270_vm2, %v1227_v16, -inf  ;;  %v324_v49 = vadd.f32 %v3004_v46, %v3871_v30 }
 0x397   :  { %v1230_v44 = vadd.f32 %v1194_v22, %v4046_v56  ;;  %v1215_v53 = vadd.f32 %v3378_v26, %v3040_v6  ;;  %v1256_v18 = vsel %vm270_vm2, %v1232_v50, -inf  ;;  %v1244_v22 = vmax.f32 %v1240_v15, %v1243_v4 }
 0x398   :  { %v1206_v40 = vpop.f32.mrf.mxu1  ;;  %v1250_v26 = vmax.f32 %v1246_v17, %v1249_v25 }
 0x399   :  { %v1207_v45 = vadd.f32 %v3040_v6, %v1206_v40  ;;  %v1253_v9 = vsel %vm270_vm2, %v1230_v44, -inf  ;;  %v1235_v19 = vadd.f32 %v1215_v53, %v4082_v58  ;;  %v1248_v38 = vmax.f32 %v1244_v22, %v1247_v32 }
 0x39a   :  { %v3379_v29 = vpop.f32.mrf.mxu1  ;;  %v1257_v23 = vmax.f32 %v1253_v9, %v1256_v18 }
 0x39b   :  { %v1233_v59 = vadd.f32 %v1207_v45, %v4059_v10  ;;  %v1218_v60 = vadd.f32 %v3379_v29, %v3040_v6  ;;  %v1262_v35 = vsel %vm270_vm2, %v1235_v19, -inf  ;;  %v1251_v43 = vmax.f32 %v1248_v38, %v1250_v26 }
 0x39c   :  { %v1209_v7 = vpop.f32.mrf.mxu1 }
 0x39d   :  { %v1258_v11 = vsel %vm270_vm2, %v1233_v59, -inf  ;;  %v1210_v14 = vadd.f32 %v3040_v6, %v1209_v7  ;;  %v1236_v20 = vadd.f32 %v1218_v60, %v4088_v5  ;;  %v325_v60 = vadd.f32 %v3004_v46, %v3877_v34  ;;  %v3568_v46 = vld [vmem:[%s4514_s17] sm:$0xff]  }
 0x39e   :  { %v1259_v24 = vmax.f32 %v1255_v33, %v1258_v11 }
 0x39f   :  { %v1234_v21 = vadd.f32 %v1210_v14, %v4061_v12  ;;  %v1264_v37 = vsel %vm270_vm2, %v1236_v20, -inf }
 0x3a0   :  { %v1263_v40 = vmax.f32 %v1259_v24, %v1262_v35 }
 0x3a1   :  { %v1260_v6 = vsel %vm270_vm2, %v1234_v21, -inf }
 0x3a2   :  { %v1261_v28 = vmax.f32 %v1257_v23, %v1260_v6 }
 0x3a4   :  { %v1265_v42 = vmax.f32 %v1261_v28, %v1264_v37 }
 0x3a6   :  { %v1266_v44 = vmax.f32 %v1263_v40, %v1265_v42 }
 0x3a8   :  { %v1267_v45 = vpack.c.bf16 %v1266_v44, %v1251_v43  ;;  %v3565_v43 = vld [vmem:[%s4514_s17 + $0x18] sm:$0xff]   ;;  %v3566_v44 = vld [vmem:[%s4514_s17 + $0x10] sm:$0xff]  }
 0x3a9   :  { %3393 = vmatpush3.bf16.msra.mxu1 %v3565_v43 }
 0x3aa   :  { %3389 = vmatmul.mubr.msk.bf16.vlgmr.msra.gmra.mxu0 %vm270_vm2, %v1267_v45  ;;  %3394 = vmatprep.subr.bf16.mxu1 %v3654_v13  ;;  %v3567_v45 = vld [vmem:[%s4514_s17 + $0x8] sm:$0xff]  }
 0x3ab   :  { %1635 = vmatprep.mubr.bf16.mxu0 %v3653_v3 }
 0x3ad   :  { %3395 = vmatpush3.bf16.msra.mxu1 %v3566_v44 }
 0x3ae   :  { %3396 = vmatprep.subr.bf16.mxu1 %v3654_v13 }
 0x3b1   :  { %3397 = vmatpush3.bf16.msra.mxu1 %v3567_v45 }
 0x3b2   :  { %3398 = vmatprep.subr.bf16.mxu1 %v3654_v13 }
 0x3b5   :  { %3399 = vmatpush3.bf16.msra.mxu1 %v3568_v46 }
 0x46a   :  { %v1344_v48 = vpop.f32.mrf.mxu0 }
 0x46b   :  { %v1345_v29 = vadd.f32 %v3053_v47, %v1344_v48 }
 0x46c   :  { %v3390_v50 = vpop.f32.mrf.mxu0 }
 0x46d   :  { %v1351_v53 = vadd.f32 %v1345_v29, %v324_v49 }
 0x46e   :  { %v1347_v59 = vpop.f32.mrf.mxu0 }
 0x46f   :  { %v1353_v0 = vmax.f32 %v1351_v53, 0.0  ;;  %v1348_v1 = vadd.f32 %v3053_v47, %v1347_v59 }
 0x470   :  { %v3391_v3 = vpop.f32.mrf.mxu0 }
 0x471   :  { %v1352_v4 = vadd.f32 %v1348_v1, %v325_v60  ;;  %1366 = vrot.lane.b32.xlu0 %v1353_v0, %s4529_s26  ;;  %v1355_v9 = vsel %vm382_vm3, %v1353_v0, 0.0 }
 0x473   :  { %v1354_v63 = vmax.f32 %v1352_v4, 0.0 }
 0x475   :  { %1368 = vrot.lane.b32.xlu1 %v1354_v63, %s4529_s26  ;;  %v1358_v34 = vsel %vm382_vm3, %v1354_v63, 0.0 }
 0x4e3   :  { %v1367_v7 = vpop.permute.xlu0 %1366 }
 0x4e4   :  { %v1372_v8 = vsel %vm382_vm3, %v1367_v7, 0.0 }
 0x4e5   :  { %1373 = vadd.xlane.f32.xlu0 %v1372_v8 }
 0x4e7   :  { %v1369_v30 = vpop.permute.xlu1 %1368 }
 0x4e8   :  { %v1375_v11 = vsel %vm382_vm3, %v1369_v30, 0.0 }
 0x4e9   :  { %1356 = vadd.xlane.f32.xlu0 %v1355_v9  ;;  %1376 = vadd.xlane.f32.xlu1 %v1375_v11  ;;  %v3059_v11 = vld [vmem:[%s4512_s15] ss:$0 sm:$0xff] }
 0x4ed   :  { %1359 = vadd.xlane.f32.xlu0 %v1358_v34 }
 0x56e   :  { %v1374_v14 = vpop.xlane.xlu0 %1373 }
 0x56f   :  { %v1378_v15 = vmul.f32 0.03125, %v1374_v14 }
 0x571   :  { %v1392_v16 = vsub.f32 %v1353_v0, %v1378_v15 }
 0x572   :  { %v1377_v17 = vpop.xlane.xlu1 %1376  ;;  %v1357_v21 = vpop.xlane.xlu0 %1356 }
 0x573   :  { %v1379_v33 = vmul.f32 0.03125, %v1377_v17  ;;  %v1394_v18 = vmul.f32 %v1392_v16, %v1392_v16  ;;  %v1362_v24 = vmul.f32 0.03125, %v1357_v21 }
 0x575   :  { %v1393_v19 = vsub.f32 %v1354_v63, %v1379_v33  ;;  %1398 = vrot.lane.b32.xlu1 %v1394_v18, %s4529_s26  ;;  %v1380_v6 = vsub.f32 %v1353_v0, %v1362_v24  ;;  %v3622_v24 = vld [vmem:[%s4546_s6] sm:$0xff]  }
 0x576   :  { %v1360_v22 = vpop.xlane.xlu0 %1359 }
 0x577   :  { %v1395_v20 = vmul.f32 %v1393_v19, %v1393_v19  ;;  %v1363_v23 = vmul.f32 0.03125, %v1360_v22  ;;  %v1382_v28 = vmul.f32 %v1380_v6, %v1380_v6 }
 0x579   :  { %1400 = vrot.lane.b32.xlu0 %v1395_v20, %s4529_s26  ;;  %v1381_v25 = vsub.f32 %v1354_v63, %v1363_v23  ;;  %v1384_v35 = vsel %vm382_vm3, %v1382_v28, 0.0  ;;  %v3060_v20 = vld [vmem:[%s4513_s16] ss:$0 sm:$0xff] }
 0x57a   :  { %v3061_v28 = vld [vmem:[%s4515_s18] ss:$0 sm:$0xff] }
 0x57b   :  { %v1383_v26 = vmul.f32 %v1381_v25, %v1381_v25 }
 0x57d   :  { %v1387_v32 = vsel %vm382_vm3, %v1383_v26, 0.0  ;;  %v3574_v26 = vld [vmem:[%s4542_s24 + $0x64] ss:$8 sps:$4 sm:$0xff]  }
 0x598   :  { %1388 = vadd.xlane.f32.xlu0 %v1387_v32  ;;  %v3575_v32 = vld [vmem:[%s4542_s24 + $0x50] ss:$8 sps:$4 sm:$0xff]  }
 0x599   :  { %1385 = vadd.xlane.f32.xlu1 %v1384_v35  ;;  %v3577_v35 = vld [vmem:[%s4542_s24 + $0x54] ss:$8 sps:$4 sm:$0xff]  }
 0x5e7   :  { %v1399_v37 = vpop.permute.xlu1 %1398 }
 0x5e8   :  { %v1404_v38 = vsel %vm382_vm3, %v1399_v37, 0.0  ;;  %v3580_v37 = vld [vmem:[%s4542_s24 + $0x44] ss:$8 sps:$4 sm:$0xff]  }
 0x5e9   :  { %1405 = vadd.xlane.f32.xlu1 %v1404_v38 }
 0x5eb   :  { %v1401_v40 = vpop.permute.xlu0 %1400 }
 0x5ec   :  { %v1407_v42 = vsel %vm382_vm3, %v1401_v40, 0.0 }
 0x5ed   :  { %1408 = vadd.xlane.f32.xlu0 %v1407_v42  ;;  %v3578_v42 = vld [vmem:[%s4542_s24 + $0x40] ss:$8 sps:$4 sm:$0xff]  }
 0x621   :  { %v1389_v49 = vpop.xlane.xlu0 %1388 }
 0x622   :  { %v1386_v47 = vpop.xlane.xlu1 %1385  ;;  %v1391_v29 = vmul.f32 0.03125, %v1389_v49 }
 0x623   :  { %v1390_v48 = vmul.f32 0.03125, %v1386_v47 }
 0x624   :  { %v1413_v60 = vadd.f32 1e-05, %v1391_v29 }
 0x625   :  { %v1412_v50 = vadd.f32 1e-05, %v1390_v48 }
 0x627   :  { %3606 = vrsqrt.f32 %v1412_v50 }
 0x634   :  { %v3607_v63 = vpop.eup %3606 }
 0x635   :  { %v1416_v8 = vmul.f32 %v3607_v63, %v1380_v6  ;;  %v3572_v6 = vld [vmem:[%s4542_s24 + $0x60] ss:$8 sps:$4 sm:$0xff]  }
 0x636   :  { %v3624_v63 = vld [vmem:[%s4546_s6 + $0x8] sm:$0xff]  }
 0x672   :  { %v1406_v53 = vpop.xlane.xlu1 %1405 }
 0x673   :  { %v1410_v59 = vmul.f32 0.03125, %v1406_v53 }
 0x675   :  { %v1418_v0 = vadd.f32 1e-05, %v1410_v59  ;;  %v3582_v59 = vld [vmem:[%s4505_s8 + $0x18] sm:$0xff]  }
 0x676   :  { %v1409_v1 = vpop.xlane.xlu0 %1408 }
 0x677   :  { %3608 = vrsqrt.f32 %v1418_v0  ;;  %v1411_v3 = vmul.f32 0.03125, %v1409_v1  ;;  %v3583_v0 = vld [vmem:[%s4505_s8 + $0x10] sm:$0xff]   ;;  %v3623_v1 = vld [vmem:[%s4544_s0] sm:$0x1]  ;;  %s4551_s8 = smov 96  }
 0x678   :  { %3610 = vrsqrt.f32 %v1413_v60 }
 0x679   :  { %v1419_v4 = vadd.f32 1e-05, %v1411_v3  ;;  %v3584_v3 = vld [vmem:[%s4545_s25 + $0x18] sm:$0xff]  }
 0x67a   :  { %3404 = vmatprep.subr.bf16.mxu1 %v3584_v3 }
 0x67b   :  { %3612 = vrsqrt.f32 %v1419_v4  ;;  %v3585_v4 = vld [vmem:[%s4545_s25 + $0x10] sm:$0xff]  }
 0x684   :  { %v3609_v7 = vpop.eup %3608 }
 0x685   :  { %v1422_v30 = vmul.f32 %v3609_v7, %v1392_v16  ;;  %v3611_v9 = vpop.eup %3610  ;;  %v3625_v7 = vld [vmem:[%s4546_s6 + $0x10] sm:$0xff]  }
 0x686   :  { %v1417_v15 = vmul.f32 %v3611_v9, %v1381_v25  ;;  %v3571_v25 = vld [vmem:[%s4542_s24 + $0x74] ss:$8 sps:$4 sm:$0xff]   ;;  %v3628_v9 = vld [vmem:[%s4546_s6 + $0x28] sm:$0xff]  }
 0x687   :  { %v1424_v34 = vsel %vm382_vm3, %v1416_v8, %v1422_v30  ;;  %1611 = vmatprep.subr.bf16.mxu0 %v3571_v25  ;;  %v3626_v8 = vld [vmem:[%s4546_s6 + $0x18] sm:$0xff]   ;;  %v3627_v30 = vld [vmem:[%s4546_s6 + $0x20] sm:$0xff]  }
 0x688   :  { %v3613_v14 = vpop.eup %3612  ;;  %v1433_v33 = vmul.f32 %v3059_v11, %v1424_v34  ;;  %v3630_v34 = vld [vmem:[%s4546_s6 + $0x38] sm:$0xff]  }
 0x689   :  { %v1423_v17 = vmul.f32 %v3613_v14, %v1393_v19  ;;  %v3569_v19 = vld [vmem:[%s4542_s24 + $0x70] ss:$8 sps:$4 sm:$0xff]  }
 0x68a   :  { %v1442_v22 = vadd.f32 %v3060_v20, %v1433_v33  ;;  %1612 = vmatpush1.bf16.msra.mxu0 %v3569_v19 }
 0x68b   :  { %v1425_v18 = vsel %vm382_vm3, %v1417_v15, %v1423_v17  ;;  %1613 = vmatprep.subr.bf16.mxu0 %v3574_v26 }
 0x68c   :  { %v1434_v21 = vmul.f32 %v3059_v11, %v1425_v18  ;;  %v3629_v11 = vld [vmem:[%s4546_s6 + $0x30] sm:$0xff]   ;;  %v3108_v18 = vld [vmem:[%s4547_s4 + $0x1] ss:$0 sm:$0xff]  ;;  %s4550_s6 = smov 64  }
 0x68e   :  { %v1443_v16 = vadd.f32 %v3060_v20, %v1434_v21  ;;  %1614 = vmatpush1.bf16.msra.mxu0 %v3572_v6 }
 0x68f   :  { %1615 = vmatprep.subr.bf16.mxu0 %v3577_v35  ;;  %v3587_v35 = vld [vmem:[%s4506_s9 + $0x30] sm:$0xff]  }
 0x690   :  { %v1444_v23 = vpack.c.bf16 %v1443_v16, %v1442_v22 }
 0x692   :  { %3401 = vmatmul.mubr.msk.bf16.vlgmr.msra.gmra.mxu1 %vm270_vm2, %v1444_v23  ;;  %1616 = vmatpush1.bf16.msra.mxu0 %v3575_v32  ;;  %v3586_v32 = vld [vmem:[%s4506_s9 + $0x38] sm:$0xff]  }
 0x693   :  { %3408 = vmatprep.mubr.msk.bf16.mxu1 %vm382_vm3, %v3622_v24  ;;  %1617 = vmatprep.subr.bf16.mxu0 %v3580_v37 }
 0x694   :  { %3405 = vmatpush3.bf16.msra.mxu1 %v3584_v3 }
 0x695   :  { %3406 = vmatprep.subr.bf16.mxu1 %v3585_v4 }
 0x696   :  { %1618 = vmatpush1.bf16.msra.mxu0 %v3578_v42 }
 0x697   :  { %3424 = vmatprep.subr.bf16.mxu0 %v3654_v13 }
 0x698   :  { %3407 = vmatpush3.bf16.msra.mxu1 %v3585_v4 }
 0x69b   :  { %3409 = vmatmul.mubr.msk.bf16.vlgmr.msra.gmra.mxu1 %vm382_vm3, %v3624_v63 }
 0x69c   :  { %3412 = vmatprep.mubr.msk.bf16.mxu1 %vm382_vm3, %v3625_v7 }
 0x6a3   :  { %3413 = vmatmul.mubr.msk.bf16.gmra.mxu1 %vm382_vm3, %v3626_v8 }
 0x6a4   :  { %3416 = vmatprep.mubr.msk.bf16.mxu1 %vm382_vm3, %v3627_v30 }
 0x6ab   :  { %3417 = vmatmul.mubr.msk.bf16.gmra.mxu1 %vm382_vm3, %v3628_v9 }
 0x6ac   :  { %3420 = vmatprep.mubr.msk.bf16.mxu1 %vm382_vm3, %v3629_v11 }
 0x6b3   :  { %3421 = vmatmul.mubr.msk.bf16.gmra.mxu1 %vm382_vm3, %v3630_v34 }
 0x752   :  { %v1521_v38 = vpop.f32.mrf.mxu1 }
 0x753   :  { %v1522_v40 = vadd.f32 %v3061_v28, %v1521_v38 }
 0x754   :  { %v3402_v43 = vpop.f32.mrf.mxu1 }
 0x755   :  { %v1528_v44 = vmax.f32 %v1522_v40, 0.0  ;;  %v3588_v40 = vld [vmem:[%s4506_s9 + $0x28] sm:$0xff]  }
 0x756   :  { %v1524_v45 = vpop.f32.mrf.mxu1 }
 0x757   :  { %v3200_v46 = vpack.c.bf16 %v1528_v44, %v1528_v44  ;;  %v1525_v47 = vadd.f32 %v3061_v28, %v1524_v45 }
 0x758   :  { %v3403_v48 = vpop.f32.mrf.mxu1 }
 0x759   :  { %v1529_v49 = vmax.f32 %v1525_v47, 0.0  ;;  %1536 = vrot.lane.b32.xlu1 %v3200_v46, %s3659_s28  ;;  %v3589_v47 = vld [vmem:[%s4506_s9 + $0x20] sm:$0xff]  }
 0x75b   :  { %v3201_v29 = vpack.c.bf16 %v1529_v49, %v1529_v49 }
 0x75d   :  { %1538 = vrot.lane.b32.xlu0 %v3201_v29, %s3659_s28 }
 0x7cb   :  { %v1537_v50 = vpop.permute.xlu1 %1536 }
 0x7cc   :  { %1542 = vst.msk [vmem:[#allocation2] sm:$0xf] %vm100_vm1, %v1537_v50 }
 0x7cf   :  { %v1539_v53 = vpop.permute.xlu0 %1538 }
 0x7d0   :  { %1543 = vst.msk [vmem:[#allocation2 + $0x4] sm:$0xf] %vm100_vm1, %v1539_v53 }
 0x7d7   :  { %v3581_v60 = vld [vmem:[#allocation2] sm:$0xff]  }
 0x7d8   :  { %3086 = vmatmul.mubr.msk.bf16.vlgmr.msra.gmra.mxu0 %vm270_vm2, %v3581_v60 }
 0x7d9   :  { %3425 = vmatpush3.bf16.msra.mxu0 %v3582_v59  ;;  %3428 = vmatprep.mubr.msk.bf16.mxu0 %vm3655_vm4, %v3654_v13 }
 0x7da   :  { %3426 = vmatprep.subr.bf16.mxu0 %v3654_v13 }
 0x7dd   :  { %3427 = vmatpush3.bf16.msra.mxu0 %v3583_v0 }
 0x7de   :  { %3432 = vmatprep.subr.bf16.mxu0 %v3586_v32 }
 0x7e0   :  { %3429 = vmatmul.mubr.msk.bf16.vlgmr.msra.gmra.mxu0 %vm382_vm3, %v3623_v1 }
 0x7e1   :  { %3433 = vmatpush3.bf16.msra.mxu0 %v3586_v32 }
 0x7e2   :  { %3434 = vmatprep.subr.bf16.mxu0 %v3587_v35 }
 0x7e5   :  { %3435 = vmatpush3.bf16.msra.mxu0 %v3587_v35 }
 0x7e6   :  { %3436 = vmatprep.subr.bf16.mxu0 %v3588_v40 }
 0x7e9   :  { %3437 = vmatpush3.bf16.msra.mxu0 %v3588_v40 }
 0x7ea   :  { %3438 = vmatprep.subr.bf16.mxu0 %v3589_v47 }
 0x7ed   :  { %3439 = vmatpush3.bf16.msra.mxu0 %v3589_v47  ;;  %v3592_v47 = vld [vmem:[%s4508_s11 + $0x28] sm:$0xff]  }
 0x7ee   :  { %3480 = vmatprep.subr.bf16.mxu0 %v3654_v13 }
 0x898   :  { %v4233_v14 = vpop.f32.mrf.mxu0 }
 0x89a   :  { %v4235_v15 = vpop.f32.mrf.mxu0 }
 0x89c   :  { %v4237_v17 = vpop.f32.mrf.mxu0 }
 0x89e   :  { %v4239_v33 = vpop.f32.mrf.mxu0 }
 0x8a0   :  { %v1829_v20 = vpop.f32.mrf.mxu0 }
 0x8a1   :  { %v1830_v21 = vadd.f32 %v3108_v18, %v1829_v20 }
 0x8a2   :  { %v3430_v22 = vpop.f32.mrf.mxu0 }
 0x8a3   :  { %v1842_v16 = vrot.slane %v1830_v21, %v3883_v36 }
 0x8a4   :  { %v1832_v23 = vpop.f32.mrf.mxu0 }
 0x8a5   :  { %v1843_v24 = vcombine.high %v1842_v16, %v1842_v16  ;;  %v1850_v19 = vrot.slane %v1842_v16, %v3883_v36 }
 0x8a6   :  { %v3431_v25 = vpop.f32.mrf.mxu0 }
 0x8a7   :  { %v1861_v6 = vrot.slane %v1850_v19, %v3887_v41  ;;  %v1857_v26 = vrot.slane %v1843_v24, %v3883_v36 }
 0x8a9   :  { %1866 = vrot.lane.b32.xlu1 %v1861_v6, %s4550_s6  ;;  %v1865_v28 = vrot.slane %v1857_v26, %v3887_v41 }
 0x8ad   :  { %1868 = vrot.lane.b32.xlu1 %v1865_v28, %s4550_s6 }
 0x91b   :  { %v1867_v37 = vpop.permute.xlu1 %1866 }
 0x91c   :  { %v1872_v38 = vadd.f32 %v1867_v37, %v4233_v14 }
 0x91e   :  { %v1876_v42 = vcombine.high %v1872_v38, %v1872_v38  ;;  %v1883_v43 = vrot.slane %v1872_v38, %v3883_v36 }
 0x91f   :  { %v1869_v48 = vpop.permute.xlu1 %1868 }
 0x920   :  { %v1891_v44 = vcombine.high %v1883_v43, %v1883_v43  ;;  %v1899_v45 = vrot.slane %v1883_v43, %v3883_v36  ;;  %v1890_v46 = vrot.slane %v1876_v42, %v3883_v36  ;;  %v1873_v59 = vadd.f32 %v1869_v48, %v4237_v17  ;;  %v3410_v48 = vpop.f32.mrf.mxu1 }
 0x922   :  { %v1977_v49 = vrot.slane %v1899_v45, %v3887_v41  ;;  %v1913_v29 = vrot.slane %v1891_v44, %v3883_v36  ;;  %v1921_v50 = vcombine.high %v1899_v45, %v1899_v45  ;;  %v1892_v53 = vcombine.high %v1890_v46, %v1890_v46  ;;  %v3590_v45 = vld [vmem:[%s4508_s11 + $0x38] sm:$0xff]  }
 0x923   :  { %v1906_v3 = vrot.slane %v1890_v46, %v3883_v36  ;;  %v1932_v4 = vrot.slane %v1873_v59, %v3883_v36  ;;  %v1925_v9 = vcombine.high %v1873_v59, %v1873_v59  ;;  %3456 = vmatprep.subr.bf16.mxu1 %v3590_v45 }
 0x924   :  { %2038 = vrot.lane.b32.xlu0 %v1977_v49, %s4550_s6  ;;  %v1981_v60 = vrot.slane %v1913_v29, %v3887_v41  ;;  %v1923_v0 = vcombine.high %v1913_v29, %v1913_v29  ;;  %v1985_v1 = vrot.slane %v1921_v50, %v3887_v41  ;;  %v1920_v7 = vrot.slane %v1892_v53, %v3883_v36  ;;  %v1707_v49 = vpop.f32.mrf.mxu1 }
 0x925   :  { %v1993_v8 = vrot.slane %v1906_v3, %v3887_v41  ;;  %v1922_v30 = vcombine.high %v1906_v3, %v1906_v3  ;;  %v1940_v11 = vcombine.high %v1932_v4, %v1932_v4  ;;  %v1948_v20 = vrot.slane %v1932_v4, %v3883_v36  ;;  %3457 = vmatpush3.bf16.msra.mxu1 %v3590_v45 }
 0x926   :  { %2040 = vrot.lane.b32.xlu1 %v1981_v60, %s4550_s6  ;;  %v1989_v63 = vrot.slane %v1923_v0, %v3887_v41  ;;  %v1997_v34 = vrot.slane %v1920_v7, %v3887_v41  ;;  %v1924_v18 = vcombine.high %v1920_v7, %v1920_v7  ;;  %v1939_v22 = vrot.slane %v1925_v9, %v3883_v36  ;;  %v3411_v29 = vpop.f32.mrf.mxu1 }
 0x927   :  { %v2001_v21 = vrot.slane %v1922_v30, %v3887_v41  ;;  %v1962_v23 = vrot.slane %v1940_v11, %v3883_v36  ;;  %v2009_v24 = vrot.slane %v1948_v20, %v3887_v41  ;;  %v1970_v19 = vcombine.high %v1948_v20, %v1948_v20 }
 0x928   :  { %2042 = vrot.lane.b32.xlu0 %v1985_v1, %s4550_s6  ;;  %v2005_v16 = vrot.slane %v1924_v18, %v3887_v41  ;;  %v1941_v25 = vcombine.high %v1939_v22, %v1939_v22  ;;  %v1955_v32 = vrot.slane %v1939_v22, %v3883_v36  ;;  %v1710_v50 = vpop.f32.mrf.mxu1 }
 0x929   :  { %v2013_v6 = vrot.slane %v1962_v23, %v3887_v41  ;;  %v1972_v26 = vcombine.high %v1962_v23, %v1962_v23  ;;  %v2017_v28 = vrot.slane %v1970_v19, %v3887_v41 }
 0x92a   :  { %2044 = vrot.lane.b32.xlu1 %v1989_v63, %s4550_s6  ;;  %v1969_v37 = vrot.slane %v1941_v25, %v3883_v36  ;;  %v2025_v38 = vrot.slane %v1955_v32, %v3887_v41  ;;  %v1971_v40 = vcombine.high %v1955_v32, %v1955_v32  ;;  %v3591_v36 = vld [vmem:[%s4508_s11 + $0x30] sm:$0xff]   ;;  %v3414_v53 = vpop.f32.mrf.mxu1 }
 0x92b   :  { %v2021_v35 = vrot.slane %v1972_v26, %v3887_v41  ;;  %3458 = vmatprep.subr.bf16.mxu1 %v3591_v36 }
 0x92c   :  { %2046 = vrot.lane.b32.xlu0 %v1993_v8, %s4550_s6  ;;  %v2029_v42 = vrot.slane %v1969_v37, %v3887_v41  ;;  %v1973_v43 = vcombine.high %v1969_v37, %v1969_v37  ;;  %v2033_v44 = vrot.slane %v1971_v40, %v3887_v41  ;;  %3459 = vmatpush3.bf16.msra.mxu1 %v3591_v36  ;;  %v1723_v59 = vpop.f32.mrf.mxu1 }
 0x92d   :  { %3460 = vmatprep.subr.bf16.mxu1 %v3592_v47 }
 0x92e   :  { %2048 = vrot.lane.b32.xlu1 %v1997_v34, %s4550_s6  ;;  %v2037_v46 = vrot.slane %v1973_v43, %v3887_v41  ;;  %v3415_v60 = vpop.f32.mrf.mxu1 }
 0x930   :  { %2050 = vrot.lane.b32.xlu0 %v2001_v21, %s4550_s6  ;;  %3461 = vmatpush3.bf16.msra.mxu1 %v3592_v47  ;;  %v1726_v0 = vpop.f32.mrf.mxu1 }
 0x932   :  { %2052 = vrot.lane.b32.xlu1 %v2005_v16, %s4550_s6  ;;  %v3418_v3 = vpop.f32.mrf.mxu1 }
 0x934   :  { %2054 = vrot.lane.b32.xlu0 %v2009_v24, %s4550_s6  ;;  %v1739_v9 = vpop.f32.mrf.mxu1 }
 0x936   :  { %2056 = vrot.lane.b32.xlu1 %v2013_v6, %s4550_s6  ;;  %v3419_v24 = vpop.f32.mrf.mxu1 }
 0x938   :  { %2058 = vrot.lane.b32.xlu0 %v2017_v28, %s4550_s6  ;;  %v1742_v40 = vpop.f32.mrf.mxu1 }
 0x93a   :  { %2060 = vrot.lane.b32.xlu1 %v2021_v35, %s4550_s6 }
 0x93c   :  { %2062 = vrot.lane.b32.xlu0 %v2025_v38, %s4550_s6 }
 0x93e   :  { %2064 = vrot.lane.b32.xlu1 %v2029_v42, %s4550_s6 }
 0x940   :  { %2066 = vrot.lane.b32.xlu0 %v2033_v44, %s4550_s6 }
 0x942   :  { %2068 = vrot.lane.b32.xlu1 %v2037_v46, %s4550_s6 }
 0x996   :  { %v2039_v41 = vpop.permute.xlu0 %2038 }
 0x997   :  { %v2086_v1 = vadd.f32 %v2039_v41, %v4233_v14 }
 0x998   :  { %v2041_v4 = vpop.permute.xlu1 %2040 }
 0x999   :  { %v2102_v63 = vadd.f32 %v2086_v1, %v1707_v49  ;;  %v2087_v7 = vadd.f32 %v2041_v4, %v4233_v14 }
 0x99a   :  { %v2043_v8 = vpop.permute.xlu0 %2042 }
 0x99b   :  { %v2088_v30 = vadd.f32 %v2043_v8, %v4233_v14  ;;  %v2103_v11 = vadd.f32 %v2087_v7, %v1710_v50  ;;  %v2118_v18 = vmax.f32 %v2102_v63, 0.0 }
 0x99c   :  { %v2045_v34 = vpop.permute.xlu1 %2044 }
 0x99d   :  { %v2119_v20 = vmax.f32 %v2103_v11, 0.0  ;;  %v2104_v21 = vadd.f32 %v3410_v48, %v2088_v30  ;;  %v2089_v22 = vadd.f32 %v2045_v34, %v4233_v14 }
 0x99e   :  { %v2047_v16 = vpop.permute.xlu0 %2046 }
 0x99f   :  { %v2090_v23 = vadd.f32 %v2047_v16, %v4233_v14  ;;  %v2134_v19 = vpack.c.bf16 %v2119_v20, %v2118_v18  ;;  %v2105_v25 = vadd.f32 %v3411_v29, %v2089_v22  ;;  %v2120_v26 = vmax.f32 %v2104_v21, 0.0  ;;  %v3422_v29 = vpop.f32.mrf.mxu1 }
 0x9a0   :  { %v2049_v6 = vpop.permute.xlu1 %2048 }
 0x9a1   :  { %v2121_v28 = vmax.f32 %v2105_v25, 0.0  ;;  %v2106_v32 = vadd.f32 %v2090_v23, %v1723_v59  ;;  %v2091_v35 = vadd.f32 %v2049_v6, %v4233_v14  ;;  %3440 = vmatprep.mubr.msk.bf16.mxu0 %vm270_vm2, %v2134_v19 }
 0x9a2   :  { %v2051_v37 = vpop.permute.xlu0 %2050 }
 0x9a3   :  { %v2092_v38 = vadd.f32 %v2051_v37, %v4233_v14  ;;  %v2135_v42 = vpack.c.bf16 %v2121_v28, %v2120_v26  ;;  %v2107_v43 = vadd.f32 %v2091_v35, %v1726_v0  ;;  %v2122_v45 = vmax.f32 %v2106_v32, 0.0 }
 0x9a4   :  { %v2053_v44 = vpop.permute.xlu1 %2052 }
 0x9a5   :  { %v2123_v36 = vmax.f32 %v2107_v43, 0.0  ;;  %v2108_v46 = vadd.f32 %v3414_v53, %v2092_v38  ;;  %v2093_v47 = vadd.f32 %v2053_v44, %v4233_v14  ;;  %3441 = vmatmul.mubr.msk.bf16.vlgmr.msra.gmra.mxu0 %vm270_vm2, %v2135_v42  ;;  %v1755_v14 = vpop.f32.mrf.mxu1 }
 0x9a6   :  { %v2055_v48 = vpop.permute.xlu0 %2054 }
 0x9a7   :  { %v2094_v49 = vadd.f32 %v2055_v48, %v4237_v17  ;;  %v2136_v50 = vpack.c.bf16 %v2123_v36, %v2122_v45  ;;  %v2109_v59 = vadd.f32 %v3415_v60, %v2093_v47  ;;  %v2124_v1 = vmax.f32 %v2108_v46, 0.0  ;;  %v3423_v22 = vpop.f32.mrf.mxu1 }
 0x9a8   :  { %v2057_v41 = vpop.permute.xlu1 %2056 }
 0x9a9   :  { %v2125_v4 = vmax.f32 %v2109_v59, 0.0  ;;  %v2110_v63 = vadd.f32 %v2094_v49, %v1739_v9  ;;  %v2095_v0 = vadd.f32 %v2057_v41, %v4237_v17  ;;  %3444 = vmatprep.mubr.msk.bf16.mxu0 %vm270_vm2, %v2136_v50  ;;  %v3593_v49 = vld [vmem:[%s4508_s11 + $0x20] sm:$0xff]  }
 0x9aa   :  { %v2059_v7 = vpop.permute.xlu0 %2058  ;;  %3462 = vmatprep.subr.bf16.mxu1 %v3593_v49  ;;  %v3121_v50 = vld [vmem:[%s4507_s10 + $0x1] ss:$0 sm:$0xff] }
 0x9ab   :  { %v2096_v53 = vadd.f32 %v2059_v7, %v4237_v17  ;;  %v2137_v8 = vpack.c.bf16 %v2125_v4, %v2124_v1  ;;  %v2111_v30 = vadd.f32 %v2095_v0, %v1742_v40  ;;  %v2126_v34 = vmax.f32 %v2110_v63, 0.0  ;;  %3463 = vmatpush3.bf16.msra.mxu1 %v3593_v49 }
 0x9ac   :  { %v2061_v11 = vpop.permute.xlu1 %2060  ;;  %3492 = vmatprep.subr.bf16.mxu1 %v3654_v13 }
 0x9ad   :  { %v2127_v18 = vmax.f32 %v2111_v30, 0.0  ;;  %v2112_v20 = vadd.f32 %v3418_v3, %v2096_v53  ;;  %v2097_v60 = vadd.f32 %v2061_v11, %v4237_v17  ;;  %3445 = vmatmul.mubr.msk.bf16.gmra.mxu0 %vm270_vm2, %v2137_v8  ;;  %v1758_v3 = vpop.f32.mrf.mxu1 }
 0x9ae   :  { %v2063_v21 = vpop.permute.xlu0 %2062 }
 0x9af   :  { %v2098_v9 = vadd.f32 %v2063_v21, %v4237_v17  ;;  %v2138_v16 = vpack.c.bf16 %v2127_v18, %v2126_v34  ;;  %v2113_v23 = vadd.f32 %v3419_v24, %v2097_v60  ;;  %v2128_v25 = vmax.f32 %v2112_v20, 0.0 }
 0x9b0   :  { %v2065_v19 = vpop.permute.xlu1 %2064 }
 0x9b1   :  { %v2129_v6 = vmax.f32 %v2113_v23, 0.0  ;;  %v2114_v26 = vadd.f32 %v2098_v9, %v1755_v14  ;;  %v2099_v28 = vadd.f32 %v2065_v19, %v4237_v17  ;;  %3448 = vmatprep.mubr.msk.bf16.mxu0 %vm270_vm2, %v2138_v16 }
 0x9b2   :  { %v2067_v32 = vpop.permute.xlu0 %2066 }
 0x9b3   :  { %v2100_v35 = vadd.f32 %v2067_v32, %v4237_v17  ;;  %v2139_v37 = vpack.c.bf16 %v2129_v6, %v2128_v25  ;;  %v2115_v38 = vadd.f32 %v2099_v28, %v1758_v3  ;;  %v2130_v42 = vmax.f32 %v2114_v26, 0.0 }
 0x9b4   :  { %v2069_v40 = vpop.permute.xlu1 %2068 }
 0x9b5   :  { %v2131_v43 = vmax.f32 %v2115_v38, 0.0  ;;  %v2116_v44 = vadd.f32 %v3422_v29, %v2100_v35  ;;  %v2101_v24 = vadd.f32 %v2069_v40, %v4237_v17  ;;  %3449 = vmatmul.mubr.msk.bf16.gmra.mxu0 %vm270_vm2, %v2139_v37 }
 0x9b7   :  { %v2140_v45 = vpack.c.bf16 %v2131_v43, %v2130_v42  ;;  %v2117_v36 = vadd.f32 %v3423_v22, %v2101_v24  ;;  %v2132_v46 = vmax.f32 %v2116_v44, 0.0 }
 0x9b9   :  { %v2133_v47 = vmax.f32 %v2117_v36, 0.0  ;;  %3452 = vmatprep.mubr.msk.bf16.mxu0 %vm270_vm2, %v2140_v45 }
 0x9bb   :  { %v2141_v48 = vpack.c.bf16 %v2133_v47, %v2132_v46 }
 0x9bd   :  { %3453 = vmatmul.mubr.msk.bf16.gmra.mxu0 %vm270_vm2, %v2141_v48 }
 0x9be   :  { %3488 = vmatprep.mubr.msk.bf16.mxu0 %vm3655_vm4, %v3654_v13 }
 0xa65   :  { %v3442_v17 = vpop.f32.mrf.mxu0 }
 0xa66   :  { %v2250_v4 = vadd.f32 %v3442_v17, %v3121_v50 }
 0xa67   :  { %v2241_v29 = vpop.f32.mrf.mxu0 }
 0xa68   :  { %v2242_v41 = vadd.f32 %v3121_v50, %v2241_v29  ;;  %v2306_v30 = vmax.f32 %v2250_v4, 0.0 }
 0xa69   :  { %v3443_v59 = vpop.f32.mrf.mxu0 }
 0xa6a   :  { %v2253_v1 = vadd.f32 %v3443_v59, %v3121_v50  ;;  %v2304_v14 = vmax.f32 %v2242_v41, 0.0 }
 0xa6b   :  { %v2244_v63 = vpop.f32.mrf.mxu0 }
 0xa6c   :  { %v2245_v0 = vadd.f32 %v3121_v50, %v2244_v63  ;;  %v2307_v7 = vmax.f32 %v2253_v1, 0.0 }
 0xa6d   :  { %v3446_v53 = vpop.f32.mrf.mxu0 }
 0xa6e   :  { %v2305_v8 = vmax.f32 %v2245_v0, 0.0  ;;  %v2321_v18 = vpack.c.bf16 %v2307_v7, %v2306_v30  ;;  %v2266_v9 = vadd.f32 %v3446_v53, %v3121_v50  ;;  %v3594_v30 = vld [vmem:[%s4510_s13 + $0x38] sm:$0xff]  }
 0xa6f   :  { %v2257_v11 = vpop.f32.mrf.mxu0  ;;  %3481 = vmatpush3.bf16.msra.mxu0 %v3594_v30 }
 0xa70   :  { %v2320_v34 = vpack.c.bf16 %v2305_v8, %v2304_v14  ;;  %v2258_v60 = vadd.f32 %v3121_v50, %v2257_v11  ;;  %v2310_v26 = vmax.f32 %v2266_v9, 0.0  ;;  %3482 = vmatprep.subr.bf16.mxu0 %v3654_v13  ;;  %v3596_v11 = vld [vmem:[%s4510_s13 + $0x28] sm:$0xff]  }
 0xa71   :  { %v3447_v20 = vpop.f32.mrf.mxu0 }
 0xa72   :  { %v2269_v21 = vadd.f32 %v3447_v20, %v3121_v50  ;;  %3464 = vmatprep.mubr.msk.bf16.mxu1 %vm270_vm2, %v2320_v34  ;;  %v2308_v25 = vmax.f32 %v2258_v60, 0.0  ;;  %v3597_v34 = vld [vmem:[%s4510_s13 + $0x20] sm:$0xff]  }
 0xa73   :  { %v2260_v22 = vpop.f32.mrf.mxu0  ;;  %3465 = vmatmul.mubr.msk.bf16.vlgmr.msra.gmra.mxu1 %vm270_vm2, %v2321_v18 }
 0xa74   :  { %v2261_v16 = vadd.f32 %v3121_v50, %v2260_v22  ;;  %v2311_v23 = vmax.f32 %v2269_v21, 0.0 }
 0xa75   :  { %v3450_v19 = vpop.f32.mrf.mxu0 }
 0xa76   :  { %v2309_v6 = vmax.f32 %v2261_v16, 0.0  ;;  %v2323_v3 = vpack.c.bf16 %v2311_v23, %v2310_v26  ;;  %v2282_v40 = vadd.f32 %v3450_v19, %v3121_v50 }
 0xa77   :  { %v2273_v28 = vpop.f32.mrf.mxu0 }
 0xa78   :  { %v2322_v32 = vpack.c.bf16 %v2309_v6, %v2308_v25  ;;  %v2274_v37 = vadd.f32 %v3121_v50, %v2273_v28  ;;  %v2314_v46 = vmax.f32 %v2282_v40, 0.0  ;;  %v3143_v25 = vld [vmem:[%s4509_s12 + $0x1] ss:$0 sm:$0xff] }
 0xa79   :  { %v3451_v35 = vpop.f32.mrf.mxu0 }
 0xa7a   :  { %v2285_v38 = vadd.f32 %v3451_v35, %v3121_v50  ;;  %3468 = vmatprep.mubr.msk.bf16.mxu1 %vm270_vm2, %v2322_v32  ;;  %v2312_v45 = vmax.f32 %v2274_v37, 0.0 }
 0xa7b   :  { %v2276_v42 = vpop.f32.mrf.mxu0  ;;  %3469 = vmatmul.mubr.msk.bf16.gmra.mxu1 %vm270_vm2, %v2323_v3 }
 0xa7c   :  { %v2277_v43 = vadd.f32 %v3121_v50, %v2276_v42  ;;  %v2315_v44 = vmax.f32 %v2285_v38, 0.0 }
 0xa7d   :  { %v3454_v24 = vpop.f32.mrf.mxu0 }
 0xa7e   :  { %v2313_v36 = vmax.f32 %v2277_v43, 0.0  ;;  %v2325_v49 = vpack.c.bf16 %v2315_v44, %v2314_v46  ;;  %v2298_v41 = vadd.f32 %v3454_v24, %v3121_v50 }
 0xa7f   :  { %v2289_v47 = vpop.f32.mrf.mxu0 }
 0xa80   :  { %v2324_v48 = vpack.c.bf16 %v2313_v36, %v2312_v45  ;;  %v2290_v29 = vadd.f32 %v3121_v50, %v2289_v47  ;;  %v2318_v53 = vmax.f32 %v2298_v41, 0.0 }
 0xa81   :  { %v3455_v17 = vpop.f32.mrf.mxu0 }
 0xa82   :  { %v2301_v59 = vadd.f32 %v3455_v17, %v3121_v50  ;;  %3472 = vmatprep.mubr.msk.bf16.mxu1 %vm270_vm2, %v2324_v48  ;;  %v2316_v0 = vmax.f32 %v2290_v29, 0.0 }
 0xa83   :  { %v2292_v1 = vpop.f32.mrf.mxu0  ;;  %3473 = vmatmul.mubr.msk.bf16.gmra.mxu1 %vm270_vm2, %v2325_v49 }
 0xa84   :  { %v2293_v4 = vadd.f32 %v3121_v50, %v2292_v1  ;;  %v2319_v63 = vmax.f32 %v2301_v59, 0.0  ;;  %v3595_v50 = vld [vmem:[%s4510_s13 + $0x30] sm:$0xff]  }
 0xa85   :  { %3483 = vmatpush3.bf16.msra.mxu0 %v3595_v50 }
 0xa86   :  { %v2317_v7 = vmax.f32 %v2293_v4, 0.0  ;;  %v2327_v8 = vpack.c.bf16 %v2319_v63, %v2318_v53  ;;  %3484 = vmatprep.subr.bf16.mxu0 %v3654_v13 }
 0xa88   :  { %v2326_v14 = vpack.c.bf16 %v2317_v7, %v2316_v0 }
 0xa89   :  { %3485 = vmatpush3.bf16.msra.mxu0 %v3596_v11 }
 0xa8a   :  { %3476 = vmatprep.mubr.msk.bf16.mxu1 %vm270_vm2, %v2326_v14  ;;  %3486 = vmatprep.subr.bf16.mxu0 %v3654_v13 }
 0xa8b   :  { %3477 = vmatmul.mubr.msk.bf16.gmra.mxu1 %vm270_vm2, %v2327_v8 }
 0xa8c   :  { %3500 = vmatprep.mubr.msk.bf16.mxu1 %vm3655_vm4, %v3654_v13 }
 0xa8d   :  { %3487 = vmatpush3.bf16.msra.mxu0 %v3597_v34 }
 0xa8e   :  { %3504 = vmatprep.subr.bf16.mxu0 %v3654_v13 }
 0xb33   :  { %v3466_v18 = vpop.f32.mrf.mxu1 }
 0xb34   :  { %v2436_v38 = vadd.f32 %v3466_v18, %v3143_v25 }
 0xb35   :  { %v2427_v20 = vpop.f32.mrf.mxu1 }
 0xb36   :  { %v2428_v6 = vadd.f32 %v3143_v25, %v2427_v20  ;;  %v2492_v17 = vadd.f32 %v2436_v38, %v4040_v54 }
 0xb37   :  { %v3467_v60 = vpop.f32.mrf.mxu1 }
 0xb38   :  { %v2439_v32 = vadd.f32 %v3467_v60, %v3143_v25  ;;  %v2490_v40 = vadd.f32 %v2428_v6, %v4036_v51  ;;  %v2508_v8 = vsel %vm270_vm2, %v2492_v17, -inf }
 0xb39   :  { %v2430_v21 = vpop.f32.mrf.mxu1 }
 0xb3a   :  { %v2431_v28 = vadd.f32 %v3143_v25, %v2430_v21  ;;  %v2493_v36 = vadd.f32 %v2439_v32, %v4042_v31  ;;  %v2506_v29 = vsel %vm270_vm2, %v2490_v40, -inf }
 0xb3b   :  { %v3470_v9 = vpop.f32.mrf.mxu1 }
 0xb3c   :  { %v2491_v44 = vadd.f32 %v2431_v28, %v4038_v52 }
 0xb3d   :  { %v2443_v22 = vpop.f32.mrf.mxu1 }
 0xb3e   :  { %v2444_v42 = vadd.f32 %v3143_v25, %v2443_v22  ;;  %v2507_v52 = vsel %vm270_vm2, %v2491_v44, -inf }
 0xb3f   :  { %v3471_v16 = vpop.f32.mrf.mxu1 }
 0xb40   :  { %v2494_v51 = vadd.f32 %v2444_v42, %v4052_v57  ;;  %v2455_v59 = vadd.f32 %v3471_v16, %v3143_v25  ;;  %v3088_v42 = vld [vmem:[%s4549_s3 + $0x1] ss:$0 sm:$0xff] }
 0xb41   :  { %v2446_v23 = vpop.f32.mrf.mxu1 }
 0xb42   :  { %v2447_v3 = vadd.f32 %v3143_v25, %v2446_v23  ;;  %v2497_v30 = vadd.f32 %v2455_v59, %v4073_v39 }
 0xb43   :  { %v3474_v19 = vpop.f32.mrf.mxu1 }
 0xb44   :  { %v2468_v24 = vadd.f32 %v3474_v19, %v3143_v25  ;;  %v2495_v46 = vadd.f32 %v2447_v3, %v4054_v2  ;;  %v2510_v2 = vsel %vm270_vm2, %v2493_v36, -inf }
 0xb45   :  { %v2459_v26 = vpop.f32.mrf.mxu1 }
 0xb46   :  { %v2460_v35 = vadd.f32 %v3143_v25, %v2459_v26  ;;  %v2500_v1 = vadd.f32 %v2468_v24, %v4048_v61  ;;  %v2514_v63 = vsel %vm270_vm2, %v2495_v46, -inf  ;;  %v2511_v61 = vmax.f32 %v2507_v52, %v2510_v2 }
 0xb47   :  { %v3475_v37 = vpop.f32.mrf.mxu1  ;;  %v2518_v26 = vsel %vm270_vm2, %v2497_v30, -inf  ;;  %v1654_v24 = vadd.f32 %v3088_v42, %v4235_v15 }
 0xb48   :  { %v2498_v47 = vadd.f32 %v2460_v35, %v4044_v55  ;;  %v2471_v49 = vadd.f32 %v3475_v37, %v3143_v25  ;;  %v2452_v55 = vadd.f32 %v3470_v9, %v3143_v25  ;;  %v2523_v11 = vsel %vm270_vm2, %v2500_v1, -inf }
 0xb49   :  { %v2462_v43 = vpop.f32.mrf.mxu1 }
 0xb4a   :  { %v2463_v45 = vadd.f32 %v3143_v25, %v2462_v43  ;;  %v2521_v54 = vsel %vm270_vm2, %v2498_v47, -inf  ;;  %v2501_v7 = vadd.f32 %v2471_v49, %v4050_v62  ;;  %v2509_v62 = vmax.f32 %v2506_v29, %v2508_v8  ;;  %v3165_v43 = vld [vmem:[%s4511_s14 + $0x1] ss:$0 sm:$0xff] }
 0xb4b   :  { %v3478_v48 = vpop.f32.mrf.mxu1  ;;  %v2496_v60 = vadd.f32 %v2452_v55, %v4068_v27  ;;  %v2524_v21 = vmax.f32 %v2521_v54, %v2523_v11 }
 0xb4c   :  { %v2499_v31 = vadd.f32 %v2463_v45, %v4046_v56  ;;  %v2484_v57 = vadd.f32 %v3478_v48, %v3143_v25  ;;  %v2512_v56 = vsel %vm270_vm2, %v2494_v51, -inf  ;;  %v2525_v9 = vsel %vm270_vm2, %v2501_v7, -inf }
 0xb4d   :  { %v2475_v41 = vpop.f32.mrf.mxu1  ;;  %v2513_v23 = vmax.f32 %v2509_v62, %v2512_v56  ;;  %v2516_v27 = vsel %vm270_vm2, %v2496_v60, -inf  ;;  %v1655_v48 = vadd.f32 %v3088_v42, %v4239_v33  ;;  %v3172_v42 = vld [vmem:[%s4512_s15 + $0x1] ss:$0 sm:$0xff] }
 0xb4e   :  { %v2476_v4 = vadd.f32 %v3143_v25, %v2475_v41  ;;  %v2522_v34 = vsel %vm270_vm2, %v2499_v31, -inf  ;;  %v2504_v22 = vadd.f32 %v2484_v57, %v4082_v58 }
 0xb4f   :  { %v3479_v0 = vpop.f32.mrf.mxu1  ;;  %v2526_v19 = vmax.f32 %v2522_v34, %v2525_v9  ;;  %v2517_v58 = vmax.f32 %v2513_v23, %v2516_v27  ;;  %v3599_v9 = vld [vmem:[%s4514_s17 + $0x30] sm:$0xff]  }
 0xb50   :  { %v2502_v53 = vadd.f32 %v2476_v4, %v4059_v10  ;;  %v2487_v14 = vadd.f32 %v3479_v0, %v3143_v25  ;;  %v2515_v10 = vmax.f32 %v2511_v61, %v2514_v63  ;;  %v2531_v3 = vsel %vm270_vm2, %v2504_v22, -inf  ;;  %v3600_v22 = vld [vmem:[%s4514_s17 + $0x28] sm:$0xff]  }
 0xb51   :  { %v2478_v50 = vpop.f32.mrf.mxu1 }
 0xb52   :  { %v2527_v18 = vsel %vm270_vm2, %v2502_v53, -inf  ;;  %v2479_v20 = vadd.f32 %v3143_v25, %v2478_v50  ;;  %v2505_v16 = vadd.f32 %v2487_v14, %v4088_v5  ;;  %v2519_v28 = vmax.f32 %v2515_v10, %v2518_v26 }
 0xb53   :  { %v2528_v6 = vmax.f32 %v2524_v21, %v2527_v18  ;;  %v3598_v21 = vld [vmem:[%s4514_s17 + $0x38] sm:$0xff]  }
 0xb54   :  { %v2503_v39 = vadd.f32 %v2479_v20, %v4061_v12  ;;  %v2533_v35 = vsel %vm270_vm2, %v2505_v16, -inf  ;;  %v2520_v38 = vmax.f32 %v2517_v58, %v2519_v28  ;;  %3493 = vmatpush3.bf16.msra.mxu1 %v3598_v21  ;;  %v3601_v16 = vld [vmem:[%s4514_s17 + $0x20] sm:$0xff]  }
 0xb55   :  { %v2532_v37 = vmax.f32 %v2528_v6, %v2531_v3  ;;  %3494 = vmatprep.subr.bf16.mxu1 %v3654_v13 }
 0xb56   :  { %v2529_v25 = vsel %vm270_vm2, %v2503_v39, -inf }
 0xb57   :  { %v2530_v32 = vmax.f32 %v2526_v19, %v2529_v25 }
 0xb58   :  { %3495 = vmatpush3.bf16.msra.mxu1 %v3599_v9 }
 0xb59   :  { %v2534_v5 = vmax.f32 %v2530_v32, %v2533_v35  ;;  %3496 = vmatprep.subr.bf16.mxu1 %v3654_v13 }
 0xb5b   :  { %v2535_v12 = vmax.f32 %v2532_v37, %v2534_v5 }
 0xb5c   :  { %3497 = vmatpush3.bf16.msra.mxu1 %v3600_v22 }
 0xb5d   :  { %v2536_v40 = vpack.c.bf16 %v2535_v12, %v2520_v38  ;;  %3498 = vmatprep.subr.bf16.mxu1 %v3654_v13 }
 0xb5f   :  { %3489 = vmatmul.mubr.msk.bf16.vlgmr.msra.gmra.mxu0 %vm270_vm2, %v2536_v40 }
 0xb60   :  { %3508 = vmatprep.mubr.msk.bf16.mxu0 %vm3655_vm4, %v3654_v13  ;;  %3499 = vmatpush3.bf16.msra.mxu1 %v3601_v16 }
 0xb61   :  { %3512 = vmatprep.subr.bf16.mxu1 %v3654_v13 }
 0xc1f   :  { %v2615_v44 = vpop.f32.mrf.mxu0 }
 0xc20   :  { %v2616_v45 = vadd.f32 %v3165_v43, %v2615_v44 }
 0xc21   :  { %v3490_v36 = vpop.f32.mrf.mxu0 }
 0xc22   :  { %v2622_v46 = vadd.f32 %v2616_v45, %v1654_v24 }
 0xc23   :  { %v2618_v47 = vpop.f32.mrf.mxu0 }
 0xc24   :  { %v2624_v49 = vmax.f32 %v2622_v46, 0.0  ;;  %v2619_v17 = vadd.f32 %v3165_v43, %v2618_v47  ;;  %v3174_v47 = vld [vmem:[%s4513_s16 + $0x1] ss:$0 sm:$0xff] }
 0xc25   :  { %v3491_v29 = vpop.f32.mrf.mxu0 }
 0xc26   :  { %v2623_v51 = vadd.f32 %v2619_v17, %v1655_v48  ;;  %2636 = vrot.lane.b32.xlu0 %v2624_v49, %s4551_s8  ;;  %v2626_v1 = vsel %vm382_vm3, %v2624_v49, 0.0 }
 0xc28   :  { %v2625_v59 = vmax.f32 %v2623_v51, 0.0  ;;  %v3602_v51 = vld [vmem:[%s4516_s19 + $0x8] sm:$0xff]  }
 0xc29   :  { %3505 = vmatpush3.bf16.msra.mxu0 %v3602_v51 }
 0xc2a   :  { %2638 = vrot.lane.b32.xlu1 %v2625_v59, %s4551_s8  ;;  %v2629_v33 = vsel %vm382_vm3, %v2625_v59, 0.0  ;;  %3506 = vmatprep.subr.bf16.mxu0 %v3654_v13 }
 0xc98   :  { %v2637_v41 = vpop.permute.xlu0 %2636 }
 0xc99   :  { %v2642_v52 = vsel %vm382_vm3, %v2637_v41, 0.0  ;;  %v3184_v41 = vld [vmem:[%s4515_s18 + $0x1] ss:$0 sm:$0xff] }
 0xc9a   :  { %2643 = vadd.xlane.f32.xlu0 %v2642_v52 }
 0xc9c   :  { %v2639_v15 = vpop.permute.xlu1 %2638 }
 0xc9d   :  { %v2645_v31 = vsel %vm382_vm3, %v2639_v15, 0.0 }
 0xc9e   :  { %2627 = vadd.xlane.f32.xlu0 %v2626_v1  ;;  %2646 = vadd.xlane.f32.xlu1 %v2645_v31 }
 0xca2   :  { %2630 = vadd.xlane.f32.xlu0 %v2629_v33 }
 0xd23   :  { %v2644_v4 = vpop.xlane.xlu0 %2643 }
 0xd24   :  { %v2648_v2 = vmul.f32 0.03125, %v2644_v4 }
 0xd26   :  { %v2662_v55 = vsub.f32 %v2624_v49, %v2648_v2 }
 0xd27   :  { %v2647_v63 = vpop.xlane.xlu1 %2646  ;;  %v2628_v53 = vpop.xlane.xlu0 %2627 }
 0xd28   :  { %v2649_v54 = vmul.f32 0.03125, %v2647_v63  ;;  %v2664_v0 = vmul.f32 %v2662_v55, %v2662_v55  ;;  %v2632_v61 = vmul.f32 0.03125, %v2628_v53 }
 0xd2a   :  { %v2663_v7 = vsub.f32 %v2625_v59, %v2649_v54  ;;  %2668 = vrot.lane.b32.xlu1 %v2664_v0, %s4551_s8  ;;  %v2650_v30 = vsub.f32 %v2624_v49, %v2632_v61 }
 0xd2b   :  { %v2631_v14 = vpop.xlane.xlu0 %2630 }
 0xd2c   :  { %v2665_v57 = vmul.f32 %v2663_v7, %v2663_v7  ;;  %v2633_v8 = vmul.f32 0.03125, %v2631_v14  ;;  %v2652_v11 = vmul.f32 %v2650_v30, %v2650_v30 }
 0xd2e   :  { %2670 = vrot.lane.b32.xlu0 %v2665_v57, %s4551_s8  ;;  %v2651_v56 = vsub.f32 %v2625_v59, %v2633_v8  ;;  %v2654_v18 = vsel %vm382_vm3, %v2652_v11, 0.0  ;;  %v3603_v59 = vld [vmem:[%s4516_s19] sm:$0xff]  }
 0xd2f   :  { %3507 = vmatpush3.bf16.msra.mxu0 %v3603_v59 }
 0xd30   :  { %v2653_v50 = vmul.f32 %v2651_v56, %v2651_v56 }
 0xd32   :  { %v2657_v34 = vsel %vm382_vm3, %v2653_v50, 0.0 }
 0xd4d   :  { %2658 = vadd.xlane.f32.xlu0 %v2657_v34 }
 0xd4e   :  { %2655 = vadd.xlane.f32.xlu1 %v2654_v18 }
 0xd9c   :  { %v2669_v20 = vpop.permute.xlu1 %2668 }
 0xd9d   :  { %v2674_v62 = vsel %vm382_vm3, %v2669_v20, 0.0 }
 0xd9e   :  { %2675 = vadd.xlane.f32.xlu1 %v2674_v62 }
 0xda0   :  { %v2671_v60 = vpop.permute.xlu0 %2670 }
 0xda1   :  { %v2677_v10 = vsel %vm382_vm3, %v2671_v60, 0.0 }
 0xda2   :  { %2678 = vadd.xlane.f32.xlu0 %v2677_v10 }
 0xdd6   :  { %v2659_v19 = vpop.xlane.xlu0 %2658 }
 0xdd7   :  { %v2656_v39 = vpop.xlane.xlu1 %2655  ;;  %v2661_v6 = vmul.f32 0.03125, %v2659_v19  ;;  %v3605_v19 = vld [vmem:[%s4518_s21] sm:$0xff]  }
 0xdd8   :  { %v2660_v23 = vmul.f32 0.03125, %v2656_v39 }
 0xdd9   :  { %v2683_v32 = vadd.f32 1e-05, %v2661_v6 }
 0xdda   :  { %v2682_v26 = vadd.f32 1e-05, %v2660_v23  ;;  %v3604_v23 = vld [vmem:[%s4518_s21 + $0x8] sm:$0xff]  }
 0xddc   :  { %3614 = vrsqrt.f32 %v2682_v26 }
 0xde9   :  { %v3615_v37 = vpop.eup %3614 }
 0xdea   :  { %v2686_v38 = vmul.f32 %v3615_v37, %v2650_v30  ;;  %v3196_v37 = vld [vmem:[%s4519_s22] ss:$0 sm:$0xff] }
 0xe27   :  { %v2676_v25 = vpop.xlane.xlu1 %2675 }
 0xe28   :  { %v2680_v28 = vmul.f32 0.03125, %v2676_v25  ;;  %v3192_v25 = vld [vmem:[%s4517_s20] ss:$0 sm:$0xff]  ;;  %s3631_s20 = scalar_lea.vmem %s2987_s30, 32 }
 0xe29   :  { %p3632_p0 = scmp.ne.s32.totalorder %s2987_s30, %s3631_s20  ;;  %p3637_p2 = scmp.lt.s32.totalorder %s3631_s20, %s3631_s20 }
 0xe2a   :  { %v2688_v27 = vadd.f32 1e-05, %v2680_v28 }
 0xe2b   :  { %v2679_v3 = vpop.xlane.xlu0 %2678  ;;  %p3638_p3 = por %p3637_p2, %p3636_p1 }
 0xe2c   :  { %3616 = vrsqrt.f32 %v2688_v27  ;;  %v2681_v35 = vmul.f32 0.03125, %v2679_v3 }
 0xe2d   :  { %3618 = vrsqrt.f32 %v2683_v32  ;;  %p3639_p4 = pnand %p3638_p3, %p3632_p0 }
 0xe2e   :  { %v2689_v58 = vadd.f32 1e-05, %v2681_v35 }
 0xe30   :  { %3620 = vrsqrt.f32 %v2689_v58 }
 0xe39   :  { %v3617_v5 = vpop.eup %3616 }
 0xe3a   :  { %v2692_v12 = vmul.f32 %v3617_v5, %v2662_v55  ;;  %v3619_v40 = vpop.eup %3618 }
 0xe3b   :  { %v2687_v24 = vmul.f32 %v3619_v40, %v2651_v56 }
 0xe3c   :  { %v2694_v43 = vsel %vm382_vm3, %v2686_v38, %v2692_v12 }
 0xe3d   :  { %v3621_v44 = vpop.eup %3620  ;;  %v2704_v36 = vmul.f32 %v3172_v42, %v2694_v43 }
 0xe3e   :  { %v2693_v45 = vmul.f32 %v3621_v44, %v2663_v7 }
 0xe3f   :  { %v2714_v49 = vadd.f32 %v3174_v47, %v2704_v36 }
 0xe40   :  { %v2695_v46 = vsel %vm382_vm3, %v2687_v24, %v2693_v45 }
 0xe41   :  { %v2705_v48 = vmul.f32 %v3172_v42, %v2695_v46 }
 0xe43   :  { %v2715_v17 = vadd.f32 %v3174_v47, %v2705_v48 }
 0xe45   :  { %v2716_v29 = vpack.c.bf16 %v2715_v17, %v2714_v49 }
 0xe47   :  { %3501 = vmatmul.mubr.msk.bf16.vlgmr.msra.gmra.mxu1 %vm270_vm2, %v2716_v29 }
 0xe48   :  { %3516 = vmatprep.mubr.msk.bf16.mxu1 %vm3655_vm4, %v3654_v13  ;;  %3513 = vmatpush3.bf16.msra.mxu1 %v3604_v23 }
 0xe49   :  { %3514 = vmatprep.subr.bf16.mxu1 %v3654_v13 }
 0xe4c   :  { %3515 = vmatpush3.bf16.msra.mxu1 %v3605_v19 }
 0xf07   :  { %v2795_v52 = vpop.f32.mrf.mxu1 }
 0xf08   :  { %v2796_v15 = vadd.f32 %v3184_v41, %v2795_v52 }
 0xf09   :  { %v3502_v1 = vpop.f32.mrf.mxu1 }
 0xf0a   :  { %v2802_v31 = vmax.f32 %v2796_v15, 0.0 }
 0xf0b   :  { %v2798_v33 = vpop.f32.mrf.mxu1 }
 0xf0c   :  { %v3202_v4 = vpack.c.bf16 %v2802_v31, %v2802_v31  ;;  %v2818_v2 = vsel %vm382_vm3, %v2802_v31, 0.0  ;;  %v2799_v55 = vadd.f32 %v3184_v41, %v2798_v33 }
 0xf0d   :  { %v2819_v63 = vrot.slane %v2818_v2, 4  ;;  %v3503_v54 = vpop.f32.mrf.mxu1 }
 0xf0e   :  { %v2803_v0 = vmax.f32 %v2799_v55, 0.0  ;;  %2810 = vrot.lane.b32.xlu1 %v3202_v4, %s3659_s28 }
 0xf0f   :  { %v2820_v7 = vadd.f32 %v2819_v63, %v2818_v2 }
 0xf10   :  { %v3203_v57 = vpack.c.bf16 %v2803_v0, %v2803_v0  ;;  %v2825_v53 = vsel %vm382_vm3, %v2803_v0, 0.0 }
 0xf11   :  { %v2821_v14 = vrot.slane %v2820_v7, 2  ;;  %v2826_v8 = vrot.slane %v2825_v53, 4 }
 0xf12   :  { %2812 = vrot.lane.b32.xlu0 %v3203_v57, %s3659_s28 }
 0xf13   :  { %v2822_v61 = vadd.f32 %v2821_v14, %v2820_v7  ;;  %v2827_v56 = vadd.f32 %v2826_v8, %v2825_v53 }
 0xf15   :  { %v2823_v30 = vrot.slane %v2822_v61, 1  ;;  %v2828_v50 = vrot.slane %v2827_v56, 2 }
 0xf17   :  { %v2824_v11 = vadd.f32 %v2823_v30, %v2822_v61  ;;  %v2829_v34 = vadd.f32 %v2828_v50, %v2827_v56 }
 0xf19   :  { %v2833_v18 = vmul.f32 0.125, %v2824_v11  ;;  %v2830_v20 = vrot.slane %v2829_v34, 1 }
 0xf1b   :  { %v2831_v62 = vadd.f32 %v2830_v20, %v2829_v34  ;;  %v2835_v60 = vpack.c.bf16 %v2833_v18, %v2833_v18 }
 0xf1d   :  { %v2834_v10 = vmul.f32 0.125, %v2831_v62  ;;  %v2850_v9 = vunpack.c.l.b16 %v2835_v60 }
 0xf1f   :  { %v2836_v21 = vpack.c.bf16 %v2834_v10, %v2834_v10 }
 0xf21   :  { %v2851_v22 = vunpack.c.l.b16 %v2836_v21 }
 0xf23   :  { %v2853_v16 = vsel %vm2852_vm5, %v2851_v22, %v2850_v9 }
 0xf24   :  { %v2854_v39 = vpack.c.b16 %v2853_v16, %v2853_v16 }
 0xf26   :  { %3509 = vmatmul.mubr.msk.bf16.vlgmr.msra.gmra.mxu0 %vm382_vm3, %v2854_v39 }
 0xf80   :  { %v2811_v6 = vpop.permute.xlu1 %2810 }
 0xf81   :  { %2816 = vst.msk [vmem:[#allocation2] sm:$0xf] %vm100_vm1, %v2811_v6 }
 0xf84   :  { %v2813_v26 = vpop.permute.xlu0 %2812 }
 0xf85   :  { %2817 = vst.msk [vmem:[#allocation2 + $0x4] sm:$0xf] %vm100_vm1, %v2813_v26 }
 0xfe6   :  { %v2904_v28 = vpop.f32.mrf.mxu0 }
 0xfe7   :  { %v2905_v32 = vadd.f32 %v3192_v25, %v2904_v28 }
 0xfe8   :  { %v3510_v27 = vpop.f32.mrf.mxu0 }
 0xfe9   :  { %v2910_v3 = vmax.f32 %v2905_v32, 0.0 }
 0xfea   :  { %v2907_v13 = vpop.f32.mrf.mxu0 }
 0xfeb   :  { %v2911_v35 = vpack.c.bf16 %v2910_v3, %v2910_v3 }
 0xfec   :  { %v3511_v58 = vpop.f32.mrf.mxu0 }
 0xfed   :  { %3517 = vmatmul.mubr.msk.bf16.vlgmr.msra.gmra.mxu1 %vm382_vm3, %v2911_v35 }
0x10ad   :  { %v2972_v5 = vpop.f32.mrf.mxu1 }
0x10ae   :  { %v2973_v38 = vadd.f32 %v3196_v37, %v2972_v5 }
0x10af   :  { %v3518_v12 = vpop.f32.mrf.mxu1 }
0x10b0   :  { %2979 = vst.msk [vmem:[#allocation3] sm:$0x3] %vm2978_vm6, %v2973_v38 }
0x10b1   :  { %v2975_v40 = vpop.f32.mrf.mxu1 }
0x10b2   :  { %3642 = shalt.err (!%p3639_p4)
}
0x10b3   :  { %s4552_s3 = sld [smem:[#allocation14_spill]]  ;;  %v3519_v42 = vpop.f32.mrf.mxu1 }
0x10b9   :  { %2989 = dma.vmem_to_hbm [thread:$0]  %s2987_s30, 32, %s4552_s3, [#allocation4]  }
0x10ba   :  { %3651 = dma.done.wait [#allocation4], 32  }
0x10bb   :  { %3652 = vsyncadd [#allocation4], 4294967264 }
0x10bc   :  { %2993 = vsyncpa [#allocation4], 1 }

</bundles_post_ra>
